<compile_context>
chip_gen: v7x
topology: tpu7x:2x2x1
jax: 0.10.0
libtpu: 0.0.40
codegen_flags: <defaults>
</compile_context>

<pallas_src>
import functools

import numpy as np
import jax
import jax.numpy as jnp
from jax.experimental import pallas as pl
from jax.experimental.pallas import tpu as pltpu

LN_EPS = 1e-12                      # FMLP-Rec style LayerNorm eps
LANE = 128
SUBLANE = 8
VMEM_LIMIT_BYTES = 48 * 1024 * 1024  # headroom even on v7x (64 MiB physical)


def _round_up(n, m):
    return ((n + m - 1) // m) * m


# ---------------------------------------------------------------------------
# shared math helpers
# ---------------------------------------------------------------------------
def _gelu(x):
    # TODO(synk): tanh-approx GELU; torch.nn.GELU default is erf-exact
    # (difference ~1e-3, well inside the validation tolerance).
    c = np.float32(np.sqrt(2.0 / np.pi))
    return 0.5 * x * (1.0 + jnp.tanh(c * (x + 0.044715 * x * x * x)))


def _layernorm_padded(x, g, b, n_valid):
    """LayerNorm over the last dim where only the first `n_valid` lanes are
    real data (padded lanes of x, g, b are exactly zero).  One-pass stats."""
    inv_n = np.float32(1.0 / n_valid)
    mu = jnp.sum(x, axis=-1, keepdims=True) * inv_n
    ex2 = jnp.sum(x * x, axis=-1, keepdims=True) * inv_n
    var = jnp.maximum(ex2 - mu * mu, 0.0)
    return (x - mu) * jax.lax.rsqrt(var + LN_EPS) * g + b


def _layernorm_ref(x, g, b):
    mu = jnp.mean(x, axis=-1, keepdims=True)
    var = jnp.mean((x - mu) ** 2, axis=-1, keepdims=True)
    return (x - mu) * jax.lax.rsqrt(var + LN_EPS) * g + b


# ---------------------------------------------------------------------------
# real-DFT matrices replicating torch.fft.rfft / irfft (norm='ortho')
# ---------------------------------------------------------------------------
def make_dft_mats(seq_len):
    nf = seq_len // 2 + 1
    t = np.arange(seq_len)
    f = np.arange(nf)
    ang = 2.0 * np.pi * np.outer(f, t) / seq_len          # (F, S)
    scale = 1.0 / np.sqrt(seq_len)
    dft_cos = (np.cos(ang) * scale).astype(np.float32)    # (F, S)
    dft_sin = (-np.sin(ang) * scale).astype(np.float32)   # (F, S)
    c = np.full((nf,), 2.0)
    c[0] = 1.0
    if seq_len % 2 == 0:
        c[-1] = 1.0
    idft_cos = (np.cos(ang).T * c * scale).astype(np.float32)   # (S, F)
    idft_sin = (-np.sin(ang).T * c * scale).astype(np.float32)  # (S, F)
    return dft_cos, dft_sin, idft_cos, idft_sin


def make_stacked_dft_mats(seq_len, f_pad):
    """Stack cos/sin parts so rfft is one (2*Fp, S) matmul and irfft one
    (S, 2*Fp) matmul; padded frequency rows/cols are zero."""
    dc, ds, ic, isn = make_dft_mats(seq_len)
    nf = dc.shape[0]
    fwd = np.zeros((2 * f_pad, seq_len), np.float32)
    fwd[:nf] = dc
    fwd[f_pad:f_pad + nf] = ds
    inv = np.zeros((seq_len, 2 * f_pad), np.float32)
    inv[:, :nf] = ic
    inv[:, f_pad:f_pad + nf] = isn
    return jnp.asarray(fwd), jnp.asarray(inv)


# ---------------------------------------------------------------------------
# Pallas kernel
# ---------------------------------------------------------------------------
def fmlp_kernel(x_ref, w1_ref, b1_ref, dft_ref, idft_ref,
                fwr_ref, fwi_ref, ln1g_ref, ln1b_ref,
                fcw1_ref, fcb1_ref, fcw2_ref, fcb2_ref,
                ln2g_ref, ln2b_ref,
                out_ref, acc_ref, *, h_valid, n_freq_pad):
    r = pl.program_id(1)
    tb, s, hp = acc_ref.shape
    d = x_ref.shape[-1]

    # ---- round 0: mlp1 (Linear x_dim -> hidden), flattened to 2-D matmul ----
    @pl.when(r == 0)
    def _():
        x2 = x_ref[...].reshape(tb * s, d).astype(jnp.bfloat16)
        h0 = jnp.dot(x2, w1_ref[...], preferred_element_type=jnp.float32)
        acc_ref[...] = (h0 + b1_ref[...]).reshape(tb, s, hp)

    h = acc_ref[...]                                           # (TB, S, HP) f32

    # ---- FilterMLPBlock: stacked real DFT -> complex filter -> inverse ----
    z = jnp.einsum('fs,bsh->bfh', dft_ref[...], h,
                   preferred_element_type=jnp.float32)         # (TB, 2Fp, HP)
    xr = z[:, :n_freq_pad, :]
    xi = z[:, n_freq_pad:, :]
    wr = fwr_ref[...]                                          # (Fp, HP)
    wi = fwi_ref[...]
    y = jnp.concatenate([xr * wr - xi * wi, xr * wi + xi * wr], axis=1)
    filt = jnp.einsum('sf,bfh->bsh', idft_ref[...], y,
                      preferred_element_type=jnp.float32)      # (TB, S, HP)
    # dropout == identity (eval mode)
    h1 = _layernorm_padded(filt + h, ln1g_ref[...], ln1b_ref[...], h_valid)

    # ---- FFNBlock: Linear -> GELU -> Linear -> +res -> LN (2-D matmuls) ----
    h1f = h1.reshape(tb * s, hp)
    ff = jnp.dot(h1f.astype(jnp.bfloat16), fcw1_ref[...],
                 preferred_element_type=jnp.float32) + fcb1_ref[...]
    ff = _gelu(ff)
    ff = jnp.dot(ff.astype(jnp.bfloat16), fcw2_ref[...],
                 preferred_element_type=jnp.float32) + fcb2_ref[...]
    h2 = _layernorm_padded(ff.reshape(tb, s, hp) + h1,
                           ln2g_ref[...], ln2b_ref[...], h_valid)
    acc_ref[...] = h2

    @pl.when(r == pl.num_programs(1) - 1)
    def _():
        out_ref[...] = h2.astype(out_ref.dtype)


# ---------------------------------------------------------------------------
# parameters
# ---------------------------------------------------------------------------
def init_params(key, x_dim, hidden, seq_len, rounds, init_ratio):
    nf = seq_len // 2 + 1
    ks = jax.random.split(key, 8)
    f32 = jnp.float32
    return dict(
        w1=jax.random.normal(ks[0], (x_dim, hidden), f32) / np.sqrt(x_dim),
        b1=jax.random.normal(ks[1], (1, hidden), f32) * 0.01,
        fwr=jax.random.normal(ks[2], (rounds, nf, hidden), f32) * init_ratio,
        fwi=jax.random.normal(ks[3], (rounds, nf, hidden), f32) * init_ratio,
        ln1g=jnp.ones((rounds, 1, hidden), f32),
        ln1b=jnp.zeros((rounds, 1, hidden), f32),
        fcw1=jax.random.normal(ks[4], (rounds, hidden, hidden), f32) / np.sqrt(hidden),
        fcb1=jax.random.normal(ks[5], (rounds, 1, hidden), f32) * 0.01,
        fcw2=jax.random.normal(ks[6], (rounds, hidden, hidden), f32) / np.sqrt(hidden),
        fcb2=jax.random.normal(ks[7], (rounds, 1, hidden), f32) * 0.01,
        ln2g=jnp.ones((rounds, 1, hidden), f32),
        ln2b=jnp.zeros((rounds, 1, hidden), f32),
    )


def pad_params(p, hp, fp):
    """Zero-pad hidden to a lane-dense width and freq bins to a sublane
    multiple; cast MXU weights to bf16.  Zero padding keeps padded lanes
    identically zero through the whole forward."""
    hidden = p['w1'].shape[1]
    nf = p['fwr'].shape[1]

    def lane_pad(a):
        pad = [(0, 0)] * (a.ndim - 1) + [(0, hp - hidden)]
        return jnp.pad(a, pad)

    def freq_pad(a):
        return jnp.pad(a, ((0, 0), (0, fp - nf), (0, hp - hidden)))

    def sq_pad(a):
        return jnp.pad(a, ((0, 0), (0, hp - hidden), (0, hp - hidden)))

    return dict(
        w1=lane_pad(p['w1']).astype(jnp.bfloat16),
        b1=lane_pad(p['b1']),
        fwr=freq_pad(p['fwr']),
        fwi=freq_pad(p['fwi']),
        ln1g=lane_pad(p['ln1g']),
        ln1b=lane_pad(p['ln1b']),
        fcw1=sq_pad(p['fcw1']).astype(jnp.bfloat16),
        fcb1=lane_pad(p['fcb1']),
        fcw2=sq_pad(p['fcw2']).astype(jnp.bfloat16),
        fcb2=lane_pad(p['fcb2']),
        ln2g=lane_pad(p['ln2g']),
        ln2b=lane_pad(p['ln2b']),
    )


def _pick_batch_tile(batch, seq, x_dim, hp, fp,
                     budget_bytes=(3 * VMEM_LIMIT_BYTES) // 4):
    """Largest batch tile dividing `batch` whose double-buffered working set
    fits the VMEM budget (sized so v7x's 64 MiB is also fine)."""
    # double-buffered per-round weight blocks + constant matrices
    weights = 2 * (2 * hp * hp * 2 + 2 * fp * hp * 4 + 8 * hp * 4)
    fixed = weights + (2 * fp * seq + seq * 2 * fp) * 4 + x_dim * hp * 2 + hp * 4
    tb = 1
    for cand in range(1, batch + 1):
        if batch % cand:
            continue
        per_tile = cand * seq * (2 * x_dim * 4 + 2 * hp * 4 + hp * 4)
        if fixed + per_tile <= budget_bytes:
            tb = cand
    return tb


# ---------------------------------------------------------------------------
# wrapper
# ---------------------------------------------------------------------------
def fmlp_block_forward(x, params, seq_len, *, batch_tile=None):
    """Pallas-backed FMLPBlock forward.  x: (B, S, x_dim) float32."""
    B, S, D = x.shape
    R, F, H = params['fwr'].shape
    assert S == seq_len
    HP = _round_up(H, LANE)
    FP = _round_up(F, SUBLANE)

    dft_stack, idft_stack = make_stacked_dft_mats(seq_len, FP)
    kp = pad_params(params, HP, FP)

    TB = batch_tile if batch_tile is not None else _pick_batch_tile(B, S, D, HP, FP)
    assert B % TB == 0, "batch must be divisible by the batch tile"
    grid = (B // TB, R)

    in_specs = [
        pl.BlockSpec((TB, S, D), lambda b, r: (b, 0, 0)),          # x
        pl.BlockSpec((D, HP), lambda b, r: (0, 0)),                # w1 (bf16)
        pl.BlockSpec((1, HP), lambda b, r: (0, 0)),                # b1
        pl.BlockSpec((2 * FP, S), lambda b, r: (0, 0)),            # dft_stack
        pl.BlockSpec((S, 2 * FP), lambda b, r: (0, 0)),            # idft_stack
        pl.BlockSpec((None, FP, HP), lambda b, r: (r, 0, 0)),      # fwr[r]
        pl.BlockSpec((None, FP, HP), lambda b, r: (r, 0, 0)),      # fwi[r]
        pl.BlockSpec((None, 1, HP), lambda b, r: (r, 0, 0)),       # ln1g[r]
        pl.BlockSpec((None, 1, HP), lambda b, r: (r, 0, 0)),       # ln1b[r]
        pl.BlockSpec((None, HP, HP), lambda b, r: (r, 0, 0)),      # fcw1[r] (bf16)
        pl.BlockSpec((None, 1, HP), lambda b, r: (r, 0, 0)),       # fcb1[r]
        pl.BlockSpec((None, HP, HP), lambda b, r: (r, 0, 0)),      # fcw2[r] (bf16)
        pl.BlockSpec((None, 1, HP), lambda b, r: (r, 0, 0)),       # fcb2[r]
        pl.BlockSpec((None, 1, HP), lambda b, r: (r, 0, 0)),       # ln2g[r]
        pl.BlockSpec((None, 1, HP), lambda b, r: (r, 0, 0)),       # ln2b[r]
    ]
    out_spec = pl.BlockSpec((TB, S, HP), lambda b, r: (b, 0, 0))

    args = (x, kp['w1'], kp['b1'], dft_stack, idft_stack,
            kp['fwr'], kp['fwi'], kp['ln1g'], kp['ln1b'],
            kp['fcw1'], kp['fcb1'], kp['fcw2'], kp['fcb2'],
            kp['ln2g'], kp['ln2b'])

    # advisory cost estimate for XLA scheduling
    dft_flops = 2 * B * (2 * FP) * S * HP
    ffn_flops = 2 * (2 * B * S * HP * HP)
    flops = int(2 * B * S * D * HP + R * (2 * dft_flops + ffn_flops))
    transcendentals = int(R * B * S * HP + 2 * R * B * S)
    bytes_accessed = int(x.nbytes + dft_stack.nbytes + idft_stack.nbytes
                         + sum(int(v.nbytes) for v in kp.values())
                         + B * S * HP * 4)

    out_padded = pl.pallas_call(
        functools.partial(fmlp_kernel, h_valid=H, n_freq_pad=FP),
        out_shape=jax.ShapeDtypeStruct((B, S, HP), jnp.float32),
        grid_spec=pltpu.PrefetchScalarGridSpec(
            num_scalar_prefetch=0,
            grid=grid,
            in_specs=in_specs,
            out_specs=out_spec,
            scratch_shapes=[pltpu.VMEM((TB, S, HP), jnp.float32)],
        ),
        compiler_params=pltpu.CompilerParams(
            dimension_semantics=("parallel", "arbitrary"),
            vmem_limit_bytes=VMEM_LIMIT_BYTES,
        ),
        cost_estimate=pl.CostEstimate(
            flops=flops, transcendentals=transcendentals,
            bytes_accessed=bytes_accessed),
    )(*args)

    return out_padded[..., :H]


# ---------------------------------------------------------------------------
# pure-JAX f32 reference (faithful to the PyTorch module semantics)
# ---------------------------------------------------------------------------
def fmlp_block_reference(x, params, seq_len):
    dftc, dfts, idftc, idfts = make_dft_mats(seq_len)
    h = jnp.einsum('bsd,dh->bsh', x, params['w1']) + params['b1']
    rounds = params['fwr'].shape[0]
    for r in range(rounds):
        xr = jnp.einsum('fs,bsh->bfh', dftc, h)
        xi = jnp.einsum('fs,bsh->bfh', dfts, h)
        wr, wi = params['fwr'][r], params['fwi'][r]
        yr = xr * wr - xi * wi
        yi = xr * wi + xi * wr
        filt = (jnp.einsum('sf,bfh->bsh', idftc, yr)
                + jnp.einsum('sf,bfh->bsh', idfts, yi))
        h = _layernorm_ref(filt + h, params['ln1g'][r], params['ln1b'][r])
        ff = _gelu(jnp.einsum('bsh,hk->bsk', h, params['fcw1'][r]) + params['fcb1'][r])
        ff = jnp.einsum('bsk,kh->bsh', ff, params['fcw2'][r]) + params['fcb2'][r]
        h = _layernorm_ref(ff + h, params['ln2g'][r], params['ln2b'][r])
    return h


if __name__ == "__main__":
    # Small shapes consistent with the module's forward.
    B, SEQ, X_DIM, HIDDEN, ROUND = 8, 8, 16, 32, 2
    INIT_RATIO = 0.02                       # dropout -> identity (eval mode)

    key = jax.random.PRNGKey(0)
    kx, kparam = jax.random.split(key)
    x = jax.random.normal(kx, (B, SEQ, X_DIM), jnp.float32)
    params = init_params(kparam, X_DIM, HIDDEN, SEQ, ROUND, INIT_RATIO)

    # batch_tile=4 -> grid (2 batch tiles, ROUND rounds)
    out = jax.block_until_ready(fmlp_block_forward(x, params, SEQ, batch_tile=4))
    ref = jax.block_until_ready(fmlp_block_reference(x, params, SEQ))

    assert out.shape == (B, SEQ, HIDDEN)
    assert np.all(np.isfinite(np.asarray(out)))
    # Loose-ish tolerance: the kernel feeds the MXU bf16 operands (f32 accumulate)
    # while the reference is pure f32.
    np.testing.assert_allclose(np.asarray(out), np.asarray(ref), atol=5e-2, rtol=5e-2)

    print("KERNEL_OK")
</pallas_src>

<mosaic_0001>
module attributes {stable_mosaic.version = 11 : i64} {
  func.func @fmlp_kernel(%arg0: i32, %arg1: i32, %arg2: memref<4x8x16xf32, #tpu.memory_space<vmem>>, %arg3: memref<16x128xbf16, #tpu.memory_space<vmem>>, %arg4: memref<1x128xf32, #tpu.memory_space<vmem>>, %arg5: memref<16x8xf32, #tpu.memory_space<vmem>>, %arg6: memref<8x16xf32, #tpu.memory_space<vmem>>, %arg7: memref<1x8x128xf32, #tpu.memory_space<vmem>>, %arg8: memref<1x8x128xf32, #tpu.memory_space<vmem>>, %arg9: memref<1x1x128xf32, #tpu.memory_space<vmem>>, %arg10: memref<1x1x128xf32, #tpu.memory_space<vmem>>, %arg11: memref<1x128x128xbf16, #tpu.memory_space<vmem>>, %arg12: memref<1x1x128xf32, #tpu.memory_space<vmem>>, %arg13: memref<1x128x128xbf16, #tpu.memory_space<vmem>>, %arg14: memref<1x1x128xf32, #tpu.memory_space<vmem>>, %arg15: memref<1x1x128xf32, #tpu.memory_space<vmem>>, %arg16: memref<1x1x128xf32, #tpu.memory_space<vmem>>, %arg17: memref<4x8x128xf32, #tpu.memory_space<vmem>>, %arg18: memref<4x8x128xf32, #tpu.memory_space<vmem>>) attributes {dimension_semantics = [#tpu.dimension_semantics<parallel>, #tpu.dimension_semantics<arbitrary>], iteration_bounds = array<i64: 2, 2>, scalar_prefetch = 0 : i64, scratch_operands = 1 : i64, tpu.core_type = #tpu.core_type<tc>, window_params = [{transform_indices = @transform_0, window_bounds = array<i64: 4, 8, 16>}, {pipeline_mode = #tpu.pipeline_mode<synchronous>, transform_indices = @transform_1, window_bounds = array<i64: 16, 128>}, {pipeline_mode = #tpu.pipeline_mode<synchronous>, transform_indices = @transform_2, window_bounds = array<i64: 1, 128>}, {pipeline_mode = #tpu.pipeline_mode<synchronous>, transform_indices = @transform_3, window_bounds = array<i64: 16, 8>}, {pipeline_mode = #tpu.pipeline_mode<synchronous>, transform_indices = @transform_4, window_bounds = array<i64: 8, 16>}, {transform_indices = @transform_5, window_bounds = array<i64: 1, 8, 128>}, {transform_indices = @transform_6, window_bounds = array<i64: 1, 8, 128>}, {transform_indices = @transform_7, window_bounds = array<i64: 1, 1, 128>}, {transform_indices = @transform_8, window_bounds = array<i64: 1, 1, 128>}, {transform_indices = @transform_9, window_bounds = array<i64: 1, 128, 128>}, {transform_indices = @transform_10, window_bounds = array<i64: 1, 1, 128>}, {transform_indices = @transform_11, window_bounds = array<i64: 1, 128, 128>}, {transform_indices = @transform_12, window_bounds = array<i64: 1, 1, 128>}, {transform_indices = @transform_13, window_bounds = array<i64: 1, 1, 128>}, {transform_indices = @transform_14, window_bounds = array<i64: 1, 1, 128>}, {transform_indices = @transform_15, window_bounds = array<i64: 4, 8, 128>}]} {
    %c0_i32 = arith.constant 0 : i32
    %0 = arith.cmpi eq, %arg1, %c0_i32 : i32
    %1 = arith.extui %0 : i1 to i32
    %c0_i32_0 = arith.constant 0 : i32
    %2 = arith.cmpi ne, %1, %c0_i32_0 : i32
    scf.if %2 {
      %c0_60 = arith.constant 0 : index
      %c0_61 = arith.constant 0 : index
      %c0_62 = arith.constant 0 : index
      %128 = vector.load %arg2[%c0_60, %c0_61, %c0_62] : memref<4x8x16xf32, #tpu.memory_space<vmem>>, vector<4x8x16xf32>
      %129 = vector.shape_cast %128 : vector<4x8x16xf32> to vector<32x16xf32>
      %130 = arith.truncf %129 : vector<32x16xf32> to vector<32x16xbf16>
      %c0_63 = arith.constant 0 : index
      %c0_64 = arith.constant 0 : index
      %131 = vector.load %arg3[%c0_63, %c0_64] : memref<16x128xbf16, #tpu.memory_space<vmem>>, vector<16x128xbf16>
      %cst_65 = arith.constant dense<0.000000e+00> : vector<32x128xf32>
      %132 = tpu.matmul %130, %131, %cst_65 {dimension_numbers = #tpu.dot_dimension_numbers<[1], [0], [0], [1], [0, 0, 1, 1], [], []>} : vector<32x16xbf16>, vector<16x128xbf16>, vector<32x128xf32> -> vector<32x128xf32>
      %c0_66 = arith.constant 0 : index
      %c0_67 = arith.constant 0 : index
      %133 = vector.load %arg4[%c0_66, %c0_67] : memref<1x128xf32, #tpu.memory_space<vmem>>, vector<1x128xf32>
      %134 = vector.broadcast %133 : vector<1x128xf32> to vector<32x128xf32>
      %135 = arith.addf %132, %134 : vector<32x128xf32>
      %136 = vector.shape_cast %135 : vector<32x128xf32> to vector<4x8x128xf32>
      %c0_68 = arith.constant 0 : index
      %c0_69 = arith.constant 0 : index
      %c0_70 = arith.constant 0 : index
      %137 = vector.load %arg18[%c0_68, %c0_69, %c0_70] : memref<4x8x128xf32, #tpu.memory_space<vmem>>, vector<4x8x128xf32>
      tpu.vector_store %arg18[%c0_68, %c0_69, %c0_70], %136 {strides = array<i32>} : memref<4x8x128xf32, #tpu.memory_space<vmem>>, vector<4x8x128xf32>,
    } else {
    }
    %c0 = arith.constant 0 : index
    %c0_1 = arith.constant 0 : index
    %c0_2 = arith.constant 0 : index
    %3 = vector.load %arg18[%c0, %c0_1, %c0_2] : memref<4x8x128xf32, #tpu.memory_space<vmem>>, vector<4x8x128xf32>
    %c0_3 = arith.constant 0 : index
    %c0_4 = arith.constant 0 : index
    %4 = vector.load %arg5[%c0_3, %c0_4] : memref<16x8xf32, #tpu.memory_space<vmem>>, vector<16x8xf32>
    "tpu.trace_start"() <{level = 10 : i32, message = "fs,bsh->bfh"}> : () -> ()
    %cst = arith.constant dense<0.000000e+00> : vector<4x128x16xf32>
    %5 = tpu.matmul %3, %4, %cst {dimension_numbers = #tpu.dot_dimension_numbers<[1], [1], [0, 2], [0], [0, 0, 0, 2, 1, 0], [], []>} : vector<4x8x128xf32>, vector<16x8xf32>, vector<4x128x16xf32> -> vector<4x128x16xf32>
    %6 = tpu.transpose %5, [0, 2, 1] : vector<4x128x16xf32> -> vector<4x16x128xf32>
    "tpu.trace_stop"() : () -> ()
    %7 = vector.extract_strided_slice %6 {offsets = [0, 0, 0], sizes = [4, 8, 128], strides = [1, 1, 1]} : vector<4x16x128xf32> to vector<4x8x128xf32>
    %8 = vector.extract_strided_slice %6 {offsets = [0, 8, 0], sizes = [4, 8, 128], strides = [1, 1, 1]} : vector<4x16x128xf32> to vector<4x8x128xf32>
    %c0_5 = arith.constant 0 : index
    %c0_6 = arith.constant 0 : index
    %c0_7 = arith.constant 0 : index
    %9 = vector.load %arg7[%c0_5, %c0_6, %c0_7] : memref<1x8x128xf32, #tpu.memory_space<vmem>>, vector<1x8x128xf32>
    %10 = vector.shape_cast %9 : vector<1x8x128xf32> to vector<8x128xf32>
    %c0_8 = arith.constant 0 : index
    %c0_9 = arith.constant 0 : index
    %c0_10 = arith.constant 0 : index
    %11 = vector.load %arg8[%c0_8, %c0_9, %c0_10] : memref<1x8x128xf32, #tpu.memory_space<vmem>>, vector<1x8x128xf32>
    %12 = vector.shape_cast %11 : vector<1x8x128xf32> to vector<8x128xf32>
    %13 = vector.shape_cast %10 : vector<8x128xf32> to vector<1x8x128xf32>
    %14 = vector.broadcast %13 : vector<1x8x128xf32> to vector<4x8x128xf32>
    %15 = arith.mulf %7, %14 : vector<4x8x128xf32>
    %16 = vector.shape_cast %12 : vector<8x128xf32> to vector<1x8x128xf32>
    %17 = vector.broadcast %16 : vector<1x8x128xf32> to vector<4x8x128xf32>
    %18 = arith.mulf %8, %17 : vector<4x8x128xf32>
    %19 = arith.subf %15, %18 : vector<4x8x128xf32>
    %20 = vector.shape_cast %12 : vector<8x128xf32> to vector<1x8x128xf32>
    %21 = vector.broadcast %20 : vector<1x8x128xf32> to vector<4x8x128xf32>
    %22 = arith.mulf %7, %21 : vector<4x8x128xf32>
    %23 = vector.shape_cast %10 : vector<8x128xf32> to vector<1x8x128xf32>
    %24 = vector.broadcast %23 : vector<1x8x128xf32> to vector<4x8x128xf32>
    %25 = arith.mulf %8, %24 : vector<4x8x128xf32>
    %26 = arith.addf %22, %25 : vector<4x8x128xf32>
    %27 = tpu.concatenate %19, %26 in 1 : vector<4x8x128xf32>, vector<4x8x128xf32> -> vector<4x16x128xf32>
    %c0_11 = arith.constant 0 : index
    %c0_12 = arith.constant 0 : index
    %28 = vector.load %arg6[%c0_11, %c0_12] : memref<8x16xf32, #tpu.memory_space<vmem>>, vector<8x16xf32>
    "tpu.trace_start"() <{level = 10 : i32, message = "sf,bfh->bsh"}> : () -> ()
    %cst_13 = arith.constant dense<0.000000e+00> : vector<4x128x8xf32>
    %29 = tpu.matmul %27, %28, %cst_13 {dimension_numbers = #tpu.dot_dimension_numbers<[1], [1], [0, 2], [0], [0, 0, 0, 2, 1, 0], [], []>} : vector<4x16x128xf32>, vector<8x16xf32>, vector<4x128x8xf32> -> vector<4x128x8xf32>
    %30 = tpu.transpose %29, [0, 2, 1] : vector<4x128x8xf32> -> vector<4x8x128xf32>
    "tpu.trace_stop"() : () -> ()
    %31 = arith.addf %30, %3 : vector<4x8x128xf32>
    %c0_14 = arith.constant 0 : index
    %c0_15 = arith.constant 0 : index
    %c0_16 = arith.constant 0 : index
    %32 = vector.load %arg9[%c0_14, %c0_15, %c0_16] : memref<1x1x128xf32, #tpu.memory_space<vmem>>, vector<1x1x128xf32>
    %33 = vector.shape_cast %32 : vector<1x1x128xf32> to vector<1x128xf32>
    %c0_17 = arith.constant 0 : index
    %c0_18 = arith.constant 0 : index
    %c0_19 = arith.constant 0 : index
    %34 = vector.load %arg10[%c0_17, %c0_18, %c0_19] : memref<1x1x128xf32, #tpu.memory_space<vmem>>, vector<1x1x128xf32>
    %35 = vector.shape_cast %34 : vector<1x1x128xf32> to vector<1x128xf32>
    %cst_20 = arith.constant dense<0.000000e+00> : vector<4x8xf32>
    %36 = vector.multi_reduction <add>, %31, %cst_20 [2] : vector<4x8x128xf32> to vector<4x8xf32>
    %37 = vector.shape_cast %36 : vector<4x8xf32> to vector<4x8x1xf32>
    %cst_21 = arith.constant 3.125000e-02 : f32
    %38 = vector.broadcast %cst_21 : f32 to vector<4x8x1xf32>
    %39 = arith.mulf %37, %38 : vector<4x8x1xf32>
    %40 = arith.mulf %31, %31 : vector<4x8x128xf32>
    %cst_22 = arith.constant dense<0.000000e+00> : vector<4x8xf32>
    %41 = vector.multi_reduction <add>, %40, %cst_22 [2] : vector<4x8x128xf32> to vector<4x8xf32>
    %42 = vector.shape_cast %41 : vector<4x8xf32> to vector<4x8x1xf32>
    %cst_23 = arith.constant 3.125000e-02 : f32
    %43 = vector.broadcast %cst_23 : f32 to vector<4x8x1xf32>
    %44 = arith.mulf %42, %43 : vector<4x8x1xf32>
    %45 = arith.mulf %39, %39 : vector<4x8x1xf32>
    %46 = arith.subf %44, %45 : vector<4x8x1xf32>
    %cst_24 = arith.constant 0.000000e+00 : f32
    %47 = vector.broadcast %cst_24 : f32 to vector<4x8x1xf32>
    %48 = arith.maximumf %46, %47 : vector<4x8x1xf32>
    %49 = vector.broadcast %39 : vector<4x8x1xf32> to vector<4x8x128xf32>
    %50 = arith.subf %31, %49 : vector<4x8x128xf32>
    %cst_25 = arith.constant 9.99999996E-13 : f32
    %51 = vector.broadcast %cst_25 : f32 to vector<4x8x1xf32>
    %52 = arith.addf %48, %51 : vector<4x8x1xf32>
    %53 = math.rsqrt %52 : vector<4x8x1xf32>
    %54 = vector.broadcast %53 : vector<4x8x1xf32> to vector<4x8x128xf32>
    %55 = arith.mulf %50, %54 : vector<4x8x128xf32>
    %56 = vector.shape_cast %33 : vector<1x128xf32> to vector<1x1x128xf32>
    %57 = vector.broadcast %56 : vector<1x1x128xf32> to vector<4x8x128xf32>
    %58 = arith.mulf %55, %57 : vector<4x8x128xf32>
    %59 = vector.shape_cast %35 : vector<1x128xf32> to vector<1x1x128xf32>
    %60 = vector.broadcast %59 : vector<1x1x128xf32> to vector<4x8x128xf32>
    %61 = arith.addf %58, %60 : vector<4x8x128xf32>
    %62 = vector.shape_cast %61 : vector<4x8x128xf32> to vector<32x128xf32>
    %63 = arith.truncf %62 : vector<32x128xf32> to vector<32x128xbf16>
    %c0_26 = arith.constant 0 : index
    %c0_27 = arith.constant 0 : index
    %c0_28 = arith.constant 0 : index
    %64 = vector.load %arg11[%c0_26, %c0_27, %c0_28] : memref<1x128x128xbf16, #tpu.memory_space<vmem>>, vector<1x128x128xbf16>
    %65 = vector.shape_cast %64 : vector<1x128x128xbf16> to vector<128x128xbf16>
    %cst_29 = arith.constant dense<0.000000e+00> : vector<32x128xf32>
    %66 = tpu.matmul %63, %65, %cst_29 {dimension_numbers = #tpu.dot_dimension_numbers<[1], [0], [0], [1], [0, 0, 1, 1], [], []>} : vector<32x128xbf16>, vector<128x128xbf16>, vector<32x128xf32> -> vector<32x128xf32>
    %c0_30 = arith.constant 0 : index
    %c0_31 = arith.constant 0 : index
    %c0_32 = arith.constant 0 : index
    %67 = vector.load %arg12[%c0_30, %c0_31, %c0_32] : memref<1x1x128xf32, #tpu.memory_space<vmem>>, vector<1x1x128xf32>
    %68 = vector.shape_cast %67 : vector<1x1x128xf32> to vector<1x128xf32>
    %69 = vector.broadcast %68 : vector<1x128xf32> to vector<32x128xf32>
    %70 = arith.addf %66, %69 : vector<32x128xf32>
    %cst_33 = arith.constant 5.000000e-01 : f32
    %71 = vector.broadcast %cst_33 : f32 to vector<32x128xf32>
    %72 = arith.mulf %71, %70 : vector<32x128xf32>
    %cst_34 = arith.constant 4.471500e-02 : f32
    %73 = vector.broadcast %cst_34 : f32 to vector<32x128xf32>
    %74 = arith.mulf %73, %70 : vector<32x128xf32>
    %75 = arith.mulf %74, %70 : vector<32x128xf32>
    %76 = arith.mulf %75, %70 : vector<32x128xf32>
    %77 = arith.addf %70, %76 : vector<32x128xf32>
    %cst_35 = arith.constant 0.797884583 : f32
    %78 = vector.broadcast %cst_35 : f32 to vector<32x128xf32>
    %79 = arith.mulf %78, %77 : vector<32x128xf32>
    %80 = math.tanh %79 : vector<32x128xf32>
    %cst_36 = arith.constant 1.000000e+00 : f32
    %81 = vector.broadcast %cst_36 : f32 to vector<32x128xf32>
    %82 = arith.addf %81, %80 : vector<32x128xf32>
    %83 = arith.mulf %72, %82 : vector<32x128xf32>
    %84 = arith.truncf %83 : vector<32x128xf32> to vector<32x128xbf16>
    %c0_37 = arith.constant 0 : index
    %c0_38 = arith.constant 0 : index
    %c0_39 = arith.constant 0 : index
    %85 = vector.load %arg13[%c0_37, %c0_38, %c0_39] : memref<1x128x128xbf16, #tpu.memory_space<vmem>>, vector<1x128x128xbf16>
    %86 = vector.shape_cast %85 : vector<1x128x128xbf16> to vector<128x128xbf16>
    %cst_40 = arith.constant dense<0.000000e+00> : vector<32x128xf32>
    %87 = tpu.matmul %84, %86, %cst_40 {dimension_numbers = #tpu.dot_dimension_numbers<[1], [0], [0], [1], [0, 0, 1, 1], [], []>} : vector<32x128xbf16>, vector<128x128xbf16>, vector<32x128xf32> -> vector<32x128xf32>
    %c0_41 = arith.constant 0 : index
    %c0_42 = arith.constant 0 : index
    %c0_43 = arith.constant 0 : index
    %88 = vector.load %arg14[%c0_41, %c0_42, %c0_43] : memref<1x1x128xf32, #tpu.memory_space<vmem>>, vector<1x1x128xf32>
    %89 = vector.shape_cast %88 : vector<1x1x128xf32> to vector<1x128xf32>
    %90 = vector.broadcast %89 : vector<1x128xf32> to vector<32x128xf32>
    %91 = arith.addf %87, %90 : vector<32x128xf32>
    %92 = vector.shape_cast %91 : vector<32x128xf32> to vector<4x8x128xf32>
    %93 = arith.addf %92, %61 : vector<4x8x128xf32>
    %c0_44 = arith.constant 0 : index
    %c0_45 = arith.constant 0 : index
    %c0_46 = arith.constant 0 : index
    %94 = vector.load %arg15[%c0_44, %c0_45, %c0_46] : memref<1x1x128xf32, #tpu.memory_space<vmem>>, vector<1x1x128xf32>
    %95 = vector.shape_cast %94 : vector<1x1x128xf32> to vector<1x128xf32>
    %c0_47 = arith.constant 0 : index
    %c0_48 = arith.constant 0 : index
    %c0_49 = arith.constant 0 : index
    %96 = vector.load %arg16[%c0_47, %c0_48, %c0_49] : memref<1x1x128xf32, #tpu.memory_space<vmem>>, vector<1x1x128xf32>
    %97 = vector.shape_cast %96 : vector<1x1x128xf32> to vector<1x128xf32>
    %cst_50 = arith.constant dense<0.000000e+00> : vector<4x8xf32>
    %98 = vector.multi_reduction <add>, %93, %cst_50 [2] : vector<4x8x128xf32> to vector<4x8xf32>
    %99 = vector.shape_cast %98 : vector<4x8xf32> to vector<4x8x1xf32>
    %cst_51 = arith.constant 3.125000e-02 : f32
    %100 = vector.broadcast %cst_51 : f32 to vector<4x8x1xf32>
    %101 = arith.mulf %99, %100 : vector<4x8x1xf32>
    %102 = arith.mulf %93, %93 : vector<4x8x128xf32>
    %cst_52 = arith.constant dense<0.000000e+00> : vector<4x8xf32>
    %103 = vector.multi_reduction <add>, %102, %cst_52 [2] : vector<4x8x128xf32> to vector<4x8xf32>
    %104 = vector.shape_cast %103 : vector<4x8xf32> to vector<4x8x1xf32>
    %cst_53 = arith.constant 3.125000e-02 : f32
    %105 = vector.broadcast %cst_53 : f32 to vector<4x8x1xf32>
    %106 = arith.mulf %104, %105 : vector<4x8x1xf32>
    %107 = arith.mulf %101, %101 : vector<4x8x1xf32>
    %108 = arith.subf %106, %107 : vector<4x8x1xf32>
    %cst_54 = arith.constant 0.000000e+00 : f32
    %109 = vector.broadcast %cst_54 : f32 to vector<4x8x1xf32>
    %110 = arith.maximumf %108, %109 : vector<4x8x1xf32>
    %111 = vector.broadcast %101 : vector<4x8x1xf32> to vector<4x8x128xf32>
    %112 = arith.subf %93, %111 : vector<4x8x128xf32>
    %cst_55 = arith.constant 9.99999996E-13 : f32
    %113 = vector.broadcast %cst_55 : f32 to vector<4x8x1xf32>
    %114 = arith.addf %110, %113 : vector<4x8x1xf32>
    %115 = math.rsqrt %114 : vector<4x8x1xf32>
    %116 = vector.broadcast %115 : vector<4x8x1xf32> to vector<4x8x128xf32>
    %117 = arith.mulf %112, %116 : vector<4x8x128xf32>
    %118 = vector.shape_cast %95 : vector<1x128xf32> to vector<1x1x128xf32>
    %119 = vector.broadcast %118 : vector<1x1x128xf32> to vector<4x8x128xf32>
    %120 = arith.mulf %117, %119 : vector<4x8x128xf32>
    %121 = vector.shape_cast %97 : vector<1x128xf32> to vector<1x1x128xf32>
    %122 = vector.broadcast %121 : vector<1x1x128xf32> to vector<4x8x128xf32>
    %123 = arith.addf %120, %122 : vector<4x8x128xf32>
    %c0_56 = arith.constant 0 : index
    %c0_57 = arith.constant 0 : index
    %c0_58 = arith.constant 0 : index
    %124 = vector.load %arg18[%c0_56, %c0_57, %c0_58] : memref<4x8x128xf32, #tpu.memory_space<vmem>>, vector<4x8x128xf32>
    tpu.vector_store %arg18[%c0_56, %c0_57, %c0_58], %123 {strides = array<i32>} : memref<4x8x128xf32, #tpu.memory_space<vmem>>, vector<4x8x128xf32>,
    %c1_i32 = arith.constant 1 : i32
    %125 = arith.cmpi eq, %arg1, %c1_i32 : i32
    %126 = arith.extui %125 : i1 to i32
    %c0_i32_59 = arith.constant 0 : i32
    %127 = arith.cmpi ne, %126, %c0_i32_59 : i32
    scf.if %127 {
      %c0_60 = arith.constant 0 : index
      %c0_61 = arith.constant 0 : index
      %c0_62 = arith.constant 0 : index
      %128 = vector.load %arg17[%c0_60, %c0_61, %c0_62] : memref<4x8x128xf32, #tpu.memory_space<vmem>>, vector<4x8x128xf32>
      tpu.vector_store %arg17[%c0_60, %c0_61, %c0_62], %123 {strides = array<i32>} : memref<4x8x128xf32, #tpu.memory_space<vmem>>, vector<4x8x128xf32>,
    } else {
    }
    return
  }
  func.func @transform_0(%arg0: i32, %arg1: i32) -> (i32, i32, i32) {
    %c0_i32 = arith.constant 0 : i32
    %c0_i32_0 = arith.constant 0 : i32
    %c0_i32_1 = arith.constant 0 : i32
    return %arg0, %c0_i32, %c0_i32_0 : i32, i32, i32
  }
  func.func @transform_1(%arg0: i32, %arg1: i32) -> (i32, i32) {
    %c0_i32 = arith.constant 0 : i32
    %c0_i32_0 = arith.constant 0 : i32
    %c0_i32_1 = arith.constant 0 : i32
    return %c0_i32, %c0_i32_0 : i32, i32
  }
  func.func @transform_2(%arg0: i32, %arg1: i32) -> (i32, i32) {
    %c0_i32 = arith.constant 0 : i32
    %c0_i32_0 = arith.constant 0 : i32
    %c0_i32_1 = arith.constant 0 : i32
    return %c0_i32, %c0_i32_0 : i32, i32
  }
  func.func @transform_3(%arg0: i32, %arg1: i32) -> (i32, i32) {
    %c0_i32 = arith.constant 0 : i32
    %c0_i32_0 = arith.constant 0 : i32
    %c0_i32_1 = arith.constant 0 : i32
    return %c0_i32, %c0_i32_0 : i32, i32
  }
  func.func @transform_4(%arg0: i32, %arg1: i32) -> (i32, i32) {
    %c0_i32 = arith.constant 0 : i32
    %c0_i32_0 = arith.constant 0 : i32
    %c0_i32_1 = arith.constant 0 : i32
    return %c0_i32, %c0_i32_0 : i32, i32
  }
  func.func @transform_5(%arg0: i32, %arg1: i32) -> (i32, i32, i32) {
    %c0_i32 = arith.constant 0 : i32
    %c0_i32_0 = arith.constant 0 : i32
    %c0_i32_1 = arith.constant 0 : i32
    return %arg1, %c0_i32, %c0_i32_0 : i32, i32, i32
  }
  func.func @transform_6(%arg0: i32, %arg1: i32) -> (i32, i32, i32) {
    %c0_i32 = arith.constant 0 : i32
    %c0_i32_0 = arith.constant 0 : i32
    %c0_i32_1 = arith.constant 0 : i32
    return %arg1, %c0_i32, %c0_i32_0 : i32, i32, i32
  }
  func.func @transform_7(%arg0: i32, %arg1: i32) -> (i32, i32, i32) {
    %c0_i32 = arith.constant 0 : i32
    %c0_i32_0 = arith.constant 0 : i32
    %c0_i32_1 = arith.constant 0 : i32
    return %arg1, %c0_i32, %c0_i32_0 : i32, i32, i32
  }
  func.func @transform_8(%arg0: i32, %arg1: i32) -> (i32, i32, i32) {
    %c0_i32 = arith.constant 0 : i32
    %c0_i32_0 = arith.constant 0 : i32
    %c0_i32_1 = arith.constant 0 : i32
    return %arg1, %c0_i32, %c0_i32_0 : i32, i32, i32
  }
  func.func @transform_9(%arg0: i32, %arg1: i32) -> (i32, i32, i32) {
    %c0_i32 = arith.constant 0 : i32
    %c0_i32_0 = arith.constant 0 : i32
    %c0_i32_1 = arith.constant 0 : i32
    return %arg1, %c0_i32, %c0_i32_0 : i32, i32, i32
  }
  func.func @transform_10(%arg0: i32, %arg1: i32) -> (i32, i32, i32) {
    %c0_i32 = arith.constant 0 : i32
    %c0_i32_0 = arith.constant 0 : i32
    %c0_i32_1 = arith.constant 0 : i32
    return %arg1, %c0_i32, %c0_i32_0 : i32, i32, i32
  }
  func.func @transform_11(%arg0: i32, %arg1: i32) -> (i32, i32, i32) {
    %c0_i32 = arith.constant 0 : i32
    %c0_i32_0 = arith.constant 0 : i32
    %c0_i32_1 = arith.constant 0 : i32
    return %arg1, %c0_i32, %c0_i32_0 : i32, i32, i32
  }
  func.func @transform_12(%arg0: i32, %arg1: i32) -> (i32, i32, i32) {
    %c0_i32 = arith.constant 0 : i32
    %c0_i32_0 = arith.constant 0 : i32
    %c0_i32_1 = arith.constant 0 : i32
    return %arg1, %c0_i32, %c0_i32_0 : i32, i32, i32
  }
  func.func @transform_13(%arg0: i32, %arg1: i32) -> (i32, i32, i32) {
    %c0_i32 = arith.constant 0 : i32
    %c0_i32_0 = arith.constant 0 : i32
    %c0_i32_1 = arith.constant 0 : i32
    return %arg1, %c0_i32, %c0_i32_0 : i32, i32, i32
  }
  func.func @transform_14(%arg0: i32, %arg1: i32) -> (i32, i32, i32) {
    %c0_i32 = arith.constant 0 : i32
    %c0_i32_0 = arith.constant 0 : i32
    %c0_i32_1 = arith.constant 0 : i32
    return %arg1, %c0_i32, %c0_i32_0 : i32, i32, i32
  }
  func.func @transform_15(%arg0: i32, %arg1: i32) -> (i32, i32, i32) {
    %c0_i32 = arith.constant 0 : i32
    %c0_i32_0 = arith.constant 0 : i32
    %c0_i32_1 = arith.constant 0 : i32
    return %arg0, %c0_i32, %c0_i32_0 : i32, i32, i32
  }
}

</mosaic_0001>

<bundles_post_ra>
// kernel: tpu_custom_call.1
= control target key start
LH: loop header
LB: loop body
LE: loop exit
PB: predicated region body
PF: predicated region fallthrough
CT: control target
= control target key end

     0   :  { %s5223_s0 = inlined_call_operand.hbm [shape: f32[8,8,16], index: 0, kind: input, shape index: {}]   ;;  %s5224_s1 = inlined_call_operand.hbm [shape: bf16[16,128], index: 1, kind: input, shape index: {}]   ;;  %s5225_s2 = inlined_call_operand.hbm [shape: f32[1,128], index: 2, kind: input, shape index: {}]   ;;  %s5226_s3 = inlined_call_operand.vmem [shape: f32[16,8], index: 3, kind: input, shape index: {}]   ;;  %s5227_s4 = inlined_call_operand.hbm [shape: f32[8,16], index: 4, kind: input, shape index: {}]   ;;  %s5228_s5 = inlined_call_operand.vmem [shape: f32[2,8,128], index: 5, kind: input, shape index: {}]   ;;  %s5229_s6 = inlined_call_operand.vmem [shape: f32[2,8,128], index: 6, kind: input, shape index: {}]   ;;  %s5230_s7 = inlined_call_operand.vmem [shape: f32[2,1,128], index: 7, kind: input, shape index: {}]   ;;  %s5231_s8 = inlined_call_operand.vmem [shape: f32[2,1,128], index: 8, kind: input, shape index: {}]   ;;  %s5232_s9 = inlined_call_operand.hbm [shape: bf16[2,128,128], index: 9, kind: input, shape index: {}]   ;;  %s5233_s10 = inlined_call_operand.vmem [shape: f32[2,1,128], index: 10, kind: input, shape index: {}]   ;;  %s5234_s11 = inlined_call_operand.hbm [shape: bf16[2,128,128], index: 11, kind: input, shape index: {}]   ;;  %s5235_s12 = inlined_call_operand.vmem [shape: f32[2,1,128], index: 12, kind: input, shape index: {}]   ;;  %s5236_s13 = inlined_call_operand.vmem [shape: f32[2,1,128], index: 13, kind: input, shape index: {}]   ;;  %s5237_s14 = inlined_call_operand.vmem [shape: f32[2,1,128], index: 14, kind: input, shape index: {}]   ;;  %s5238_s15 = inlined_call_operand.hbm [shape: f32[8,8,128], index: 15, kind: output, shape index: {}]  }
   0x1   :  { %5274 = sst [smem:[#allocation34_spill]] %s5223_s0 }
   0x2   :  { %5275 = sst [smem:[#allocation35_spill]] %s5224_s1 }
   0x3   :  { %5276 = sst [smem:[#allocation36_spill]] %s5225_s2 }
   0x4   :  { %5277 = sst [smem:[#allocation37_spill]] %s5226_s3 }
   0x5   :  { %5278 = sst [smem:[#allocation38_spill]] %s5227_s4 }
   0x6   :  { %5279 = sst [smem:[#allocation39_spill]] %s5228_s5 }
   0x7   :  { %5280 = sst [smem:[#allocation40_spill]] %s5229_s6 }
   0x8   :  { %5281 = sst [smem:[#allocation41_spill]] %s5230_s7 }
   0x9   :  { %5282 = sst [smem:[#allocation42_spill]] %s5231_s8 }
   0xa   :  { %5283 = sst [smem:[#allocation43_spill]] %s5232_s9 }
   0xb   :  { %5284 = sst [smem:[#allocation44_spill]] %s5233_s10 }
   0xc   :  { %5285 = sst [smem:[#allocation45_spill]] %s5234_s11 }
   0xd   :  { %5286 = sst [smem:[#allocation46_spill]] %s5235_s12 }
   0xe   :  { %5287 = sst [smem:[#allocation47_spill]] %s5236_s13 }
   0xf   :  { %5288 = sst [smem:[#allocation48_spill]] %s5237_s14 }
  0x10   :  { %5289 = sst [smem:[#allocation49_spill]] %s5238_s15 }
  0x11   :  { %20 = vsyncpa [#allocation4], 0 }
  0x12   :  { %22 = vsyncpa [#allocation4 + $0x1], 0 }
  0x13   :  { %23 = vsyncpa [#allocation7], 0 }
  0x14   :  { %24 = vsyncpa [#allocation10], 0 }
  0x15   :  { %25 = vsyncpa [#allocation5], 0 }
  0x16   :  { %27 = vsyncpa [#allocation5 + $0x1], 0  ;;  %s4452_s18 = smov 0   ;;  %s4454_s19 = smov 0  }
  0x17   :  { %s4456_s20 = smov 0   ;;  %s4458_s21 = smov 0  }
  0x18   :  { %s4460_s22 = smov 0   ;;  %s4462_s23 = smov 0  }
  0x19   :  { %s4464_s24 = smov 0   ;;  %s4466_s25 = smov 0  }
  0x1a   :  { %s4468_s26 = smov 0   ;;  %s4470_s27 = smov 0  }
  0x1b   :  { %s4472_s28 = smov 0  }
  0x1c LB: > { %5290 = sst [smem:[#allocation19_spill]] %s4321_s19  ;;  %p59_p0 = scmp.ne.s32.totalorder %s4337_s23, %s4333_s22  ;;  %s4357_s28 = sphi %s4472_s28, %s33_s28   ;;  %s4353_s27 = sphi %s4470_s27, %s5380_s27   ;;  %s4349_s26 = sphi %s4468_s26, %s5383_s26   ;;  %s4345_s25 = sphi %s4466_s25, %s5378_s25   ;;  %s4341_s24 = sphi %s4464_s24, %s5377_s24   ;;  %s4337_s23 = sphi %s4462_s23, %s5376_s23   ;;  %s4333_s22 = sphi %s4460_s22, %s5382_s22   ;;  %s4329_s21 = sphi %s4458_s21, %s5381_s21   ;;  %s4325_s20 = sphi %s4456_s20, %s5374_s20   ;;  %s4321_s19 = sphi %s4454_s19, %s5373_s19   ;;  %s4317_s18 = sphi %s4452_s18, %s5372_s18  }
  0x1d   : > { %5291 = sst [smem:[#allocation20_spill]] %s4325_s20  ;;  %p5242_p1 = scmp.eq.s32.totalorder %s4357_s28, 0 }
  0x1e   : > { %5292 = sst [smem:[#allocation21_spill]] %s4329_s21  ;;  %p5241_p2 = scmp.lt.s32.totalorder %s4357_s28, 4 }
  0x1f   : > { %5293 = sst [smem:[#allocation22_spill]] %s4337_s23  ;;  %p61_p3 = por %p5242_p1, %p59_p0 }
  0x20   : > { %5294 = sst [smem:[#allocation23_spill]] %s4341_s24  ;;  %s497_s16 = sand.u32 1, %s4357_s28  }
  0x21   : > { %5295 = sst [smem:[#allocation24_spill]] %s4345_s25  ;;  %s499_s17 = sand.u32 1, %s4337_s23  }
  0x22   : > { %5296 = sst [smem:[#allocation25_spill]] %s4349_s26  ;;  %s3263_s15 = sshll.u32 %s499_s17, 5 }
  0x23   : > { %5297 = sst [smem:[#allocation26_spill]] %s4353_s27  ;;  %s3446_s25 = sshll.u32 %s4353_s27, 9 }
  0x24   : > { %s5298_s0 = sld [smem:[#allocation34_spill]]  ;;  %s501_s30 = scalar_lea.vmem [#allocation3], %s3263_s15 }
  0x25   : > { %s508_s29 = sshll.u32 %s501_s30, 4  ;;  %p4528_p4 = pnand %p5241_p2, %p61_p3  ;;  %s4532_s29 = int_to_ptr.vmem [resolvable:$true] %s508_s29 }
  0x26   : > { %s4534_s17 = scalar_lea.sflag [#allocation4], %s497_s16 }
  0x27   : > { %p4051_p6 = pneg %p4528_p4 }
  0x2a   : > { %s4524_s13 = scalar_lea.hbm %s5298_s0, %s3446_s25  ;;  %s4054_s25 = scalar_lea.hbm %s5298_s0, 1024 }
  0x2b   : > { %s4049_s3 = scalar_lea.hbm %s4524_s13, 512  ;;  %p4055_p9 = scmp.lt.u32.totalorder %s4524_s13, %s5298_s0 }
  0x2c   : > { %p4050_p5 = scmp.ne.s32.totalorder %s4524_s13, %s4049_s3  ;;  %p4056_p10 = scmp.lt.u32.totalorder %s4054_s25, %s4049_s3 }
  0x2d   : > { %p4058_p12 = scmp.lt.u32.totalorder %s4049_s3, %s4524_s13 }
  0x2e   : > { %p4052_p7 = pnand %p4051_p6, %p4050_p5  ;;  %p4057_p11 = por %p4056_p10, %p4055_p9 }
  0x30   : > { %p4053_p8 = pneg %p4052_p7  ;;  %p4059_p13 = por %p4058_p12, %p4057_p11 }
  0x32   : > { %p4060_p3 = pnand %p4059_p13, %p4053_p8 }
  0x34   : > { %4063 = shalt.err (!%p4060_p3)
}
  0x35   : > { %s4064_s16 = scalar_lea.vmem %s4532_s29, 512  ;;  %s4359_s14 = smov [#allocation3]  }
  0x36   : > { %p4065_p5 = scmp.ne.s32.totalorder %s4532_s29, %s4064_s16  ;;  %s4069_s15 = sshll.u32 %s4359_s14, 4  ;;  %s4070_s15 = int_to_ptr.vmem [resolvable:$false] %s4069_s15 }
  0x37   : > { %s4071_s10 = scalar_lea.vmem %s4070_s15, 1024  ;;  %p4072_p1 = scmp.lt.s32.totalorder %s4532_s29, %s4070_s15 }
  0x38   : > { %p4067_p7 = pnand %p4065_p5, %p4051_p6  ;;  %p4073_p9 = scmp.lt.s32.totalorder %s4071_s10, %s4064_s16 }
  0x3a   : > { %p4068_p2 = pneg %p4067_p7  ;;  %p4074_p10 = por %p4073_p9, %p4072_p1 }
  0x3c   : > { %p4075_p11 = pnand %p4074_p10, %p4068_p2 }
  0x3e   : > { %4078 = shalt.err (!%p4075_p11)
}
  0x3f   : > { %s4360_s3 = smov 128   ;;  %s4361_s25 = smov 8  }
  0x40   : > { %3887 = dma.hbm_to_vmem [thread:$0]  (!%p4528_p4), %s4524_s13, 512, %s4532_s29, %s4534_s17, %s4360_s3, %s4360_s3, %s4361_s25  }
  0x41   : > { %s4563_s30 = sadd.s32 4294967295, %s4357_s28   ;;  %s3257_s16 = sadd.s32 4294967294, %s4357_s28  }
  0x42   : > { %p65_p1 = scmp.ne.s32.totalorder %s4333_s22, %s4329_s21  ;;  %p5247_p2 = scmp.eq.s32.totalorder %s4563_s30, 0 }
  0x43   : > { %p279_p6 = scmp.ne.s32.totalorder %s4321_s19, %s4317_s18  ;;  %p433_p8 = scmp.eq.s32.totalorder %s4563_s30, 3 }
  0x44   : > { %p4574_p12 = por %p5247_p2, %p65_p1  ;;  %p439_p4 = scmp.eq.s32.totalorder %s3257_s16, 3 }
  0x45   : > { %p4580_p13 = por %p279_p6, %p5247_p2  ;;  %p4587_p3 = por %p433_p8, %p59_p0 }
  0x46   : > { %s5300_s14 = scalar_select %p4574_p12, 1, 0 }
  0x47   : > { %s5301_s12 = scalar_select %p4580_p13, 1, 0 }
  0x48   : > { %s5303_s13 = scalar_select %p4587_p3, 1, 0 }
  0x49   : > { %5302 = sst [smem:[#allocation27_spill]] %s5301_s12  ;;  %p4591_p5 = por %p439_p4, %p65_p1 }
  0x4a   : > { %5304 = sst [smem:[#allocation28_spill]] %s5303_s13  ;;  %p3258_p7 = scmp.ge.s32.totalorder %s4357_s28, 1 }
  0x4b   : > { %s5305_s18 = scalar_select %p4591_p5, 1, 0 }
  0x4c   : > { %p446_p9 = scmp.lt.s32.totalorder %s4357_s28, 5  ;;  %s4362_s15 = smov [#allocation6]  }
  0x4d   : > { %5306 = sst [smem:[#allocation29_spill]] %s5305_s18  ;;  %s458_s10 = sshll.u32 %s4362_s15, 4  ;;  %s459_s10 = int_to_ptr.vmem [resolvable:$true] %s458_s10 }
  0x4e   : > { %p4597_p10 = pnand %p3258_p7, %p446_p9  ;;  %s42_s25 = sadd.s32 1, %s4349_s26 }
  0x4f   : > { %p4611_p1 = scmp.ge.s32.totalorder %s42_s25, 2  ;;  %s5310_s1 = sld [smem:[#allocation35_spill]] }
  0x50   : > { %s5307_s29 = scalar_select %p4597_p10, 1, 0 }
  0x51   : > { %p3874_p11 = pneg %p4597_p10 }
  0x52   : > { %s5309_s0 = scalar_select %p4611_p1, 1, 0 }
  0x53   : > { %p4605_p0 = pnand %p3874_p11, %p5247_p2 }
  0x55   : > { %s5308_s3 = scalar_select %p4605_p0, 1, 0 }
  0x56   : > { %s4079_s13 = scalar_lea.hbm %s5310_s1, 128  ;;  %p4623_p8 = pneg %p4605_p0 }
  0x57   : > { %p4080_p6 = scmp.ne.s32.totalorder %s5310_s1, %s4079_s13  ;;  %p4086_p9 = scmp.lt.u32.totalorder %s4079_s13, %s5310_s1 }
  0x59   : > { %p4082_p4 = pnand %p4623_p8, %p4080_p6 }
  0x5b   : > { %p4083_p7 = pneg %p4082_p4 }
  0x5d   : > { %p4088_p11 = pnand %p4086_p9, %p4083_p7 }
  0x5f   : > { %4091 = shalt.err (!%p4088_p11)
}
  0x60   : > { %s4092_s21 = scalar_lea.vmem %s459_s10, 128  ;;  %p4100_p13 = scmp.lt.s32.totalorder %s459_s10, %s459_s10 }
  0x61   : > { %p4093_p2 = scmp.ne.s32.totalorder %s459_s10, %s4092_s21  ;;  %p4101_p12 = scmp.lt.s32.totalorder %s4092_s21, %s4092_s21 }
  0x63   : > { %p4095_p5 = pnand %p4093_p2, %p4623_p8  ;;  %p4102_p10 = por %p4101_p12, %p4100_p13 }
  0x65   : > { %p4096_p3 = pneg %p4095_p5 }
  0x67   : > { %p4103_p1 = pnand %p4102_p10, %p4096_p3 }
  0x69   : > { %4106 = shalt.err (!%p4103_p1)
}
  0x6a   : > { %s5253_s8 = smov 64   ;;  %s5255_s5 = smov 4  }
  0x6b   : > { %3877 = dma.hbm_to_vmem [thread:$0]  (!%p4605_p0), %s5310_s1, 128, %s459_s10, [#allocation7], %s5253_s8, %s5253_s8, %s5255_s5  }
  0x6c   : > { %p5312_p2 = scmp.ne.s32.totalorder %s5309_s0, 0  ;;  %s5314_s16 = sadd.s32 1, %s4353_s27 }
  0x6d   : > { %p273_p12 = scmp.ne.s32.totalorder %s4325_s20, %s4321_s19  ;;  %p5315_p5 = scmp.eq.s32.totalorder %s4357_s28, 0 }
  0x6e   : > { %s5385_s25 = smov (%p5312_p2, %s42_s25), 0  ;;  %s5387_s16 = smov (!%p5312_p2, %s5314_s16), %s4353_s27 }
  0x6f   : > { %5313 = sst [smem:[#allocation30_spill]] %s5385_s25  ;;  %s263_s15 = ssub.s32 %s4349_s26, %s5385_s25 }
  0x70   : > { %p47_p13 = scmp.ge.s32.totalorder %s5387_s16, 2  ;;  %p264_p3 = scmp.eq.s32.totalorder %s263_s15, 0 }
  0x71   : > { %p4657_p10 = por %p273_p12, %p5315_p5  ;;  %s546_s10 = sand.u32 1, %s4325_s20  }
  0x72   : > { %s5389_s16 = smov (%p47_p13, %s5387_s16), 0  ;;  %s5318_s0 = sadd.s32 1, %s4325_s20 }
  0x73   : > { %5317 = sst [smem:[#allocation31_spill]] %s5389_s16  ;;  %s49_s18 = ssub.s32 %s4353_s27, %s5389_s16 }
  0x74   : > { %s4667_s13 = scalar_select %p264_p3, %s4325_s20, %s5318_s0  }
  0x75   : > { %s4671_s8 = sshll.u32 %s546_s10, 6  ;;  %p50_p1 = scmp.eq.s32.totalorder %s49_s18, 0 }
  0x76   : > { %5319 = sst [smem:[#allocation32_spill]] %s4667_s13  ;;  %s5262_s5 = sshll.u32 %s4349_s26, 10 }
  0x77   : > { %s548_s15 = scalar_lea.vmem [#allocation11], %s4671_s8  ;;  %s5320_s25 = sadd.s32 1, %s4337_s23 }
  0x78   : > { %s555_s1 = sshll.u32 %s548_s15, 4  ;;  %s5322_s9 = sld [smem:[#allocation43_spill]]  ;;  %s4687_s1 = int_to_ptr.vmem [resolvable:$true] %s555_s1 }
  0x79   : > { %s4678_s7 = scalar_select %p50_p1, %s4337_s23, %s5320_s25  }
  0x7a   : > { %p5323_p6 = scmp.lt.s32.totalorder %s4357_s28, 4  ;;  %s4365_s25 = smov [#allocation8]  }
  0x7b   : > { %5321 = sst [smem:[#allocation33_spill]] %s4678_s7  ;;  %s472_s0 = sshll.u32 %s4365_s25, 4  ;;  %s4697_s0 = int_to_ptr.vmem [resolvable:$true] %s472_s0 }
  0x7c   : > { %p4693_p4 = pnand %p5323_p6, %p4657_p10 }
  0x7e   : > { %s4685_s19 = scalar_lea.hbm %s5322_s9, %s5262_s5  ;;  %p5268_p9 = pneg %p4693_p4 }
  0x7f   : > { %s5324_s10 = scalar_select %p4693_p4, 1, 0 }
  0x80   : > { %s4107_s24 = scalar_lea.hbm %s4685_s19, 1024  ;;  %s4112_s18 = scalar_lea.hbm %s5322_s9, 2048 }
  0x81   : > { %p4108_p7 = scmp.ne.s32.totalorder %s4685_s19, %s4107_s24  ;;  %p4113_p12 = scmp.lt.u32.totalorder %s4685_s19, %s5322_s9 }
  0x82   : > { %p4114_p13 = scmp.lt.u32.totalorder %s4112_s18, %s4107_s24  ;;  %p4116_p5 = scmp.lt.u32.totalorder %s4107_s24, %s4685_s19 }
  0x83   : > { %p4110_p11 = pnand %p5268_p9, %p4108_p7 }
  0x84   : > { %p4115_p3 = por %p4114_p13, %p4113_p12 }
  0x85   : > { %p4111_p2 = pneg %p4110_p11 }
  0x86   : > { %p4117_p10 = por %p4116_p5, %p4115_p3 }
  0x88   : > { %p4118_p1 = pnand %p4117_p10, %p4111_p2 }
  0x8a   : > { %4121 = shalt.err (!%p4118_p1)
}
  0x8b   : > { %s4122_s25 = scalar_lea.vmem %s4687_s1, 1024  ;;  %s4366_s12 = smov [#allocation11]  }
  0x8c   : > { %p4123_p6 = scmp.ne.s32.totalorder %s4687_s1, %s4122_s25  ;;  %s4127_s21 = sshll.u32 %s4366_s12, 4  ;;  %s4128_s21 = int_to_ptr.vmem [resolvable:$false] %s4127_s21 }
  0x8d   : > { %s4129_s5 = scalar_lea.vmem %s4128_s21, 2048  ;;  %p4130_p0 = scmp.lt.s32.totalorder %s4687_s1, %s4128_s21 }
  0x8e   : > { %p4125_p7 = pnand %p4123_p6, %p5268_p9  ;;  %p4131_p12 = scmp.lt.s32.totalorder %s4129_s5, %s4122_s25 }
  0x90   : > { %p4126_p11 = pneg %p4125_p7  ;;  %p4132_p13 = por %p4131_p12, %p4130_p0 }
  0x92   : > { %p4133_p3 = pnand %p4132_p13, %p4126_p11 }
  0x94   : > { %4136 = shalt.err (!%p4133_p3)
}
  0x95   : > { %s5325_s24 = smov 4   ;;  %s5326_s18 = smov 64  }
  0x96   : > { %3890 = dma.hbm_to_vmem [thread:$0]  (!%p4693_p4), %s4685_s19, 1024, %s4687_s1, %s4534_s17, %s5326_s18, %s5326_s18, %s5325_s24  }
  0x97   : > { %s5327_s2 = sld [smem:[#allocation36_spill]] }
  0x9d   : > { %s4137_s12 = scalar_lea.hbm %s5327_s2, 16 }
  0x9e   : > { %p4138_p0 = scmp.ne.s32.totalorder %s5327_s2, %s4137_s12  ;;  %p4144_p10 = scmp.lt.u32.totalorder %s4137_s12, %s5327_s2 }
  0xa0   : > { %p4140_p2 = pnand %p4138_p0, %p4623_p8 }
  0xa2   : > { %p4141_p5 = pneg %p4140_p2 }
  0xa4   : > { %p4146_p1 = pnand %p4144_p10, %p4141_p5 }
  0xa6   : > { %4149 = shalt.err (!%p4146_p1)
}
  0xa7   : > { %s4150_s1 = scalar_lea.vmem %s4697_s0, 16  ;;  %s4157_s9 = scalar_lea.vmem %s4697_s0, 32 }
  0xa8   : > { %p4151_p6 = scmp.ne.s32.totalorder %s4697_s0, %s4150_s1  ;;  %p4158_p12 = scmp.lt.s32.totalorder %s4697_s0, %s4697_s0 }
  0xa9   : > { %p4159_p13 = scmp.lt.s32.totalorder %s4157_s9, %s4150_s1 }
  0xaa   : > { %p4153_p7 = pnand %p4151_p6, %p4623_p8 }
  0xab   : > { %p4160_p3 = por %p4159_p13, %p4158_p12 }
  0xac   : > { %p4154_p11 = pneg %p4153_p7 }
  0xae   : > { %p4161_p0 = pnand %p4160_p3, %p4154_p11 }
  0xb0   : > { %4164 = shalt.err (!%p4161_p0)
}
  0xb1   : > { %p5328_p2 = scmp.ne.s32.totalorder %s5308_s3, 0  ;;  %s4367_s15 = smov [#allocation9]  }
  0xb2   : > { %s486_s12 = sshll.u32 %s4367_s15, 4  ;;  %s5329_s21 = sshll.u32 %s4349_s26, 10  ;;  %s487_s12 = int_to_ptr.vmem [resolvable:$true] %s486_s12 }
  0xb3   : > { %3880 = dma.hbm_to_vmem [thread:$0]  (!%p5328_p2), %s5327_s2, 16, %s4697_s0, [#allocation7]  }
  0xb4   : > { %s5330_s11 = sld [smem:[#allocation45_spill]]  ;;  %s5331_s4 = sld [smem:[#allocation38_spill]] }
  0xba   : > { %s4757_s1 = scalar_lea.hbm %s5330_s11, %s5329_s21  ;;  %s4165_s7 = scalar_lea.hbm %s5331_s4, 128 }
  0xbb   : > { %p4166_p5 = scmp.ne.s32.totalorder %s5331_s4, %s4165_s7  ;;  %p4172_p6 = scmp.lt.u32.totalorder %s4165_s7, %s5331_s4 }
  0xbd   : > { %p4168_p10 = pnand %p4166_p5, %p4623_p8 }
  0xbf   : > { %p4169_p1 = pneg %p4168_p10 }
  0xc1   : > { %p4174_p7 = pnand %p4172_p6, %p4169_p1 }
  0xc3   : > { %4177 = shalt.err (!%p4174_p7)
}
  0xc4   : > { %s4178_s16 = scalar_lea.vmem %s487_s12, 128  ;;  %p4186_p3 = scmp.lt.s32.totalorder %s487_s12, %s487_s12 }
  0xc5   : > { %p4179_p11 = scmp.ne.s32.totalorder %s487_s12, %s4178_s16  ;;  %p4187_p0 = scmp.lt.s32.totalorder %s4178_s16, %s4178_s16 }
  0xc7   : > { %p4181_p12 = pnand %p4179_p11, %p4623_p8  ;;  %p4188_p9 = por %p4187_p0, %p4186_p3 }
  0xc9   : > { %p4182_p13 = pneg %p4181_p12 }
  0xcb   : > { %p4189_p4 = pnand %p4188_p9, %p4182_p13 }
  0xcd   : > { %4192 = shalt.err (!%p4189_p4)
}
  0xce   : > { %3883 = dma.hbm_to_vmem [thread:$0]  (!%p5328_p2), %s5331_s4, 128, %s487_s12, [#allocation10]  }
  0xcf   : > { %s575_s6 = scalar_lea.vmem [#allocation12], %s4671_s8  ;;  %s4193_s13 = scalar_lea.hbm %s4757_s1, 1024 }
  0xd0   : > { %s582_s7 = sshll.u32 %s575_s6, 4  ;;  %p4194_p8 = scmp.ne.s32.totalorder %s4757_s1, %s4193_s13  ;;  %s4778_s7 = int_to_ptr.vmem [resolvable:$true] %s582_s7 }
  0xd1   : > { %p5332_p9 = scmp.ne.s32.totalorder %s5324_s10, 0  ;;  %s4198_s21 = scalar_lea.hbm %s5330_s11, 2048 }
  0xd2   : > { %p4199_p1 = scmp.lt.u32.totalorder %s4757_s1, %s5330_s11  ;;  %p4200_p6 = scmp.lt.u32.totalorder %s4198_s21, %s4193_s13 }
  0xd3   : > { %p5333_p4 = pneg %p5332_p9  ;;  %p4202_p7 = scmp.lt.u32.totalorder %s4193_s13, %s4757_s1 }
  0xd4   : > { %p4201_p2 = por %p4200_p6, %p4199_p1 }
  0xd5   : > { %p4196_p5 = pnand %p4194_p8, %p5333_p4 }
  0xd6   : > { %p4203_p11 = por %p4202_p7, %p4201_p2 }
  0xd7   : > { %p4197_p10 = pneg %p4196_p5 }
  0xd9   : > { %p4204_p12 = pnand %p4203_p11, %p4197_p10 }
  0xdb   : > { %4207 = shalt.err (!%p4204_p12)
}
  0xdc   : > { %s4208_s8 = scalar_lea.vmem %s4778_s7, 1024  ;;  %p5334_p3 = pmov %p5333_p4 }
  0xdd   : > { %p4209_p13 = scmp.ne.s32.totalorder %s4778_s7, %s4208_s8  ;;  %s4368_s12 = smov [#allocation12]  }
  0xde   : > { %s4213_s9 = sshll.u32 %s4368_s12, 4  ;;  %s4214_s9 = int_to_ptr.vmem [resolvable:$false] %s4213_s9 }
  0xdf   : > { %p4211_p0 = pnand %p4209_p13, %p5334_p3  ;;  %s4215_s0 = scalar_lea.vmem %s4214_s9, 2048 }
  0xe0   : > { %p4216_p4 = scmp.lt.s32.totalorder %s4778_s7, %s4214_s9  ;;  %p4217_p5 = scmp.lt.s32.totalorder %s4215_s0, %s4208_s8 }
  0xe1   : > { %p4212_p8 = pneg %p4211_p0 }
  0xe2   : > { %p4218_p1 = por %p4217_p5, %p4216_p4 }
  0xe4   : > { %p4219_p6 = pnand %p4218_p1, %p4212_p8 }
  0xe6   : > { %4222 = shalt.err (!%p4219_p6)
}
  0xe7   : > { %3893 = dma.hbm_to_vmem [thread:$0]  (!%p5332_p9), %s4757_s1, 1024, %s4778_s7, %s4534_s17, %s5326_s18, %s5326_s18, %s5325_s24  }
  0xe8   : > { %p5335_p10 = scmp.ne.s32.totalorder %s5307_s29, 0 }
  0xe9   : > { %s614_s19 = sand.u32 (!%p5335_p10), 1, %s4563_s30   ;;  %s5271_s16 = sand.u32 (!%p5335_p10), 1, %s4333_s22  }
  0xea   : > { %612 = sbr.rel (%p5335_p10) target bundleno = 2550 (0x9f6), region = 80  ;;  %s3273_s23 = sshll.u32 (!%p5335_p10), %s5271_s16, 5 }
  0xeb   : > { %s615_s27 = scalar_lea.sflag (!%p5335_p10), [#allocation4], %s614_s19  ;;  %s4813_s10 = scalar_lea.vmem (!%p5335_p10), [#allocation3], %s3273_s23 }
  0xec   : > { %p5336_p2 = scmp.ne.s32.totalorder (!%p5335_p10), %s5300_s14, 0 }
  0xf1   : > { %4296 = dma.done.wait (%p5336_p2), %s615_s27, 512  }
  0xf2   : > { %4298 = vsyncadd (%p5336_p2), %s615_s27, 4294966784  ;;  %p5337_p9 = scmp.eq.s32.totalorder %s4563_s30, 0 }
  0xf4   : > { %4300 = dma.done.wait (%p5337_p9), [#allocation7], 144   ;;  %p5338_p7 = pmov %p5337_p9 }
  0xf6   : > { %4302 = vsyncadd (%p5338_p7), [#allocation7], 4294967152  ;;  %p5339_p11 = pmov %p5338_p7 }
  0xf7   : > { %p5340_p12 = pmov %p5338_p7 }
  0xf8   : > { %4304 = dma.done.wait (%p5339_p11), [#allocation10], 128  }
  0xf9   : > { %4306 = vsyncadd (%p5340_p12), [#allocation10], 4294967168  ;;  %s5341_s17 = sld [smem:[#allocation19_spill]]  ;;  %s5342_s29 = sld [smem:[#allocation27_spill]] }
  0xff   : > { %s637_s24 = sand.u32 1, %s5341_s17   ;;  %p5343_p13 = scmp.ne.s32.totalorder %s5342_s29, 0 }
 0x100   : > { %s3277_s18 = sshll.u32 %s637_s24, 6 }
 0x101   : > { %s4828_s1 = scalar_lea.vmem [#allocation11], %s3277_s18 }
 0x102   : > { %4308 = dma.done.wait (%p5343_p13), %s615_s27, 2048  }
 0x103   : > { %4310 = vsyncadd (%p5343_p13), %s615_s27, 4294965248  ;;  %s5344_s14 = sld [smem:[#allocation23_spill]]  ;;  %s5346_s5 = sld [smem:[#allocation39_spill]] }
 0x104   : > { %s5347_s0 = sld [smem:[#allocation40_spill]]  ;;  %s5348_s29 = sld [smem:[#allocation42_spill]] }
 0x105   : > { %s5349_s4 = sld [smem:[#allocation44_spill]]  ;;  %s5350_s3 = sld [smem:[#allocation46_spill]] }
 0x106   : > { %s4875_s27 = scalar_lea.vmem [#allocation13], %s3273_s23 }
 0x109   : > { %p732_p3 = scmp.lt.s32.totalorder %s5344_s14, 1  ;;  %p3282_p0 = scmp.ne.s32.totalorder %s5344_s14, 0 }
 0x10a   : > { %v4004_v0 = vld [vmem:[#allocation6] sm:$0xff] (!%p3282_p0)   ;;  %v765_v2 = vld [vmem:[%s4813_s10 + $0x8] sm:$0xff] (!%p3282_p0)  ;;  %vm785_vm0 = vcmask (!%p3282_p0), 130048   ;;  %v766_v3 = vld [vmem:[%s4813_s10 + $0x10] sm:$0xff] (!%p3282_p0) }
 0x10b   : > { %s4836_s6 = scalar_select %p732_p3, %s5344_s14, 1 }
 0x10c   : > { %v764_v1 = vld [vmem:[%s4813_s10] sm:$0xff] (!%p3282_p0)  ;;  %3604 = vmatprep.subr.bf16.mxu0 (!%p3282_p0), %v4004_v0  ;;  %v767_v5 = vld [vmem:[%s4813_s10 + $0x18] sm:$0xff] (!%p3282_p0)  ;;  %v3283_v7 = vld [vmem:[#allocation8] ss:$0 sm:$0xff] (!%p3282_p0) }
 0x10d   : > { %s3280_s30 = sshll.u32 %s4836_s6, 3  ;;  %s745_s24 = scalar_lea.vmem %s5348_s29, %s4836_s6  ;;  %v768_v4 = vpack.c.bf16 (!%p3282_p0), %v765_v2, %v764_v1  ;;  %3605 = vmatpush3.bf16.msra.mxu0 (!%p3282_p0), %v4004_v0  ;;  %v769_v6 = vpack.c.bf16 (!%p3282_p0), %v767_v5, %v766_v3 }
 0x10e   : > { %s4846_s8 = scalar_lea.vmem %s5346_s5, %s3280_s30  ;;  %s4851_s19 = scalar_lea.vmem %s5347_s0, %s3280_s30 }
 0x10f   : > { %s748_s11 = scalar_lea.vmem %s5349_s4, %s4836_s6  ;;  %s751_s15 = scalar_lea.vmem %s5350_s3, %s4836_s6  ;;  %3606 = vmatprep.mubr.msk.bf16.mxu0 (!%p3282_p0), %vm785_vm0, %v768_v4 }
 0x110   : > { %s5351_s5 = sld [smem:[#allocation47_spill]]  ;;  %s5352_s30 = sld [smem:[#allocation48_spill]]  ;;  %3607 = vmatmul.mubr.msk.bf16.vlgmr.msra.gmra.mrb[0].mxu0 (!%p3282_p0), %vm785_vm0, %v769_v6 }
 0x111   : > { %s4873_s0 = scalar_lea.vmem [#allocation12], %s3277_s18  ;;  %763 = sbr.rel (%p3282_p0) target bundleno = 490 (0x1ea), region = 108 }
 0x116   : > { %s754_s26 = scalar_lea.vmem %s5351_s5, %s4836_s6  ;;  %s757_s9 = scalar_lea.vmem %s5352_s30, %s4836_s6 }
 0x1e3   : > { %v3608_v8 = vpop.f32.mrb[0].mxu0 }
 0x1e4   : > { %v835_v9 = vadd.f32 %v3608_v8, %v3283_v7  ;;  %v826_v10 = vpop.f32.mrb[1].mxu0 }
 0x1e5   : > { %v827_v11 = vadd.f32 %v3283_v7, %v826_v10  ;;  %v3609_v12 = vpop.f32.mrb[2].mxu0 }
 0x1e6   : > { %843 = vst [vmem:[#allocation2 + $0x10] sm:$0xff] %v835_v9  ;;  %v838_v13 = vadd.f32 %v3609_v12, %v3283_v7  ;;  %v829_v14 = vpop.f32.mrb[3].mxu0 }
 0x1e7   : > { %841 = vst [vmem:[#allocation2] sm:$0xff] %v827_v11  ;;  %v830_v15 = vadd.f32 %v3283_v7, %v829_v14 }
 0x1e8   : > { %844 = vst [vmem:[#allocation2 + $0x18] sm:$0xff] %v838_v13 }
 0x1e9   : > { %842 = vst [vmem:[#allocation2 + $0x8] sm:$0xff] %v830_v15 }
 0x1ea PF: > { %s5353_s20 = sld [smem:[#allocation37_spill]]  ;;  %vm979_vm1 = vcmask 64512   ;;  %vm1846_vm3 = vcmask 130048  }
 0x1eb   : > { %vm3849_vm2 = vmpackc.low %vm979_vm1, %vm979_vm1 }
 0x1ed   : > { %v847_v20 = vld [vmem:[#allocation2 + $0x10] sm:$0xff] }
 0x1ee   : > { %v845_v16 = vld [vmem:[#allocation2] sm:$0xff]  ;;  %915 = vxpose.xlu1.b32.start.end [1/1] (short) %v847_v20, 128 }
 0x1ef   : > { %851 = vxpose.xlu0.b32.start.end [1/1] (short) %v845_v16, 128  ;;  %v848_v22 = vld [vmem:[#allocation2 + $0x18] sm:$0xff] }
 0x1f0   : > { %s5354_s16 = smov %s5353_s20  ;;  %v849_v17 = vld [vmem:[%s5353_s20] sm:$0xff]  ;;  %v846_v21 = vld [vmem:[#allocation2 + $0x8] sm:$0xff] }
 0x1f1   : > { %v850_v18 = vld [vmem:[%s5354_s16 + $0x8] sm:$0xff] }
 0x1f2   : > { %v3848_v19 = vpack.c.bf16 %v850_v18, %v849_v17 }
 0x1f4   : > { %3850 = vmatprep.subr.msk.bf16.mxu0 %vm3849_vm2, %v3848_v19 }
 0x1f5   : > { %3853 = vmatpush3.bf16.xpose.msk.msra.mxu0 %vm3849_vm2, %v3848_v19 }
 0x22b   : > { %947 = vxpose.xlu1.b32.start.end [1/1] (short) %v848_v22, 128 }
 0x22c   : > { %883 = vxpose.xlu0.b32.start.end [1/1] (short) %v846_v21, 128 }
 0x26e   : > { %v931_v36 = vpop.trf.xlu1 }
 0x26f   : > { %v867_v23 = vpop.trf.xlu0 }
 0x270   : > { %3614 = vmatprep.mubr.msk.f32.mxu0 %vm979_vm1, %v867_v23 }
 0x272   : > { %v932_v38 = vpop.trf.xlu1 }
 0x273   : > { %v868_v24 = vpop.trf.xlu0 }
 0x274   : > { %3615 = vmatmul.mubr.msk.f32.vlgmr.msra.gmra.mrb[0].mxu0 %vm979_vm1, %v868_v24 }
 0x276   : > { %v933_v40 = vpop.trf.xlu1 }
 0x277   : > { %v869_v25 = vpop.trf.xlu0 }
 0x278   : > { %3617 = vmatprep.mubr.msk.f32.mxu0 %vm979_vm1, %v869_v25 }
 0x27a   : > { %v934_v42 = vpop.trf.xlu1 }
 0x27b   : > { %v870_v26 = vpop.trf.xlu0 }
 0x27c   : > { %3618 = vmatmul.mubr.msk.f32.gmra.mrb[2].mxu0 %vm979_vm1, %v870_v26 }
 0x27e   : > { %v935_v44 = vpop.trf.xlu1 }
 0x27f   : > { %v871_v27 = vpop.trf.xlu0 }
 0x280   : > { %3620 = vmatprep.mubr.msk.f32.mxu0 %vm979_vm1, %v871_v27 }
 0x282   : > { %v936_v46 = vpop.trf.xlu1 }
 0x283   : > { %v872_v28 = vpop.trf.xlu0 }
 0x284   : > { %3621 = vmatmul.mubr.msk.f32.gmra.mrb[4].mxu0 %vm979_vm1, %v872_v28 }
 0x286   : > { %v937_v48 = vpop.trf.xlu1 }
 0x287   : > { %v873_v29 = vpop.trf.xlu0 }
 0x288   : > { %3623 = vmatprep.mubr.msk.f32.mxu0 %vm979_vm1, %v873_v29 }
 0x28a   : > { %v938_v50 = vpop.trf.xlu1 }
 0x28b   : > { %v874_v30 = vpop.trf.xlu0 }
 0x28c   : > { %3624 = vmatmul.mubr.msk.f32.gmra.mrb[6].mxu0 %vm979_vm1, %v874_v30 }
 0x28e   : > { %v939_v52 = vpop.trf.xlu1 }
 0x28f   : > { %v875_v31 = vpop.trf.xlu0 }
 0x290   : > { %3626 = vmatprep.mubr.msk.f32.mxu0 %vm979_vm1, %v875_v31 }
 0x292   : > { %v940_v54 = vpop.trf.xlu1 }
 0x293   : > { %v876_v32 = vpop.trf.xlu0 }
 0x294   : > { %3627 = vmatmul.mubr.msk.f32.gmra.mrb[8].mxu0 %vm979_vm1, %v876_v32 }
 0x296   : > { %v941_v56 = vpop.trf.xlu1 }
 0x297   : > { %v877_v33 = vpop.trf.xlu0 }
 0x298   : > { %3629 = vmatprep.mubr.msk.f32.mxu0 %vm979_vm1, %v877_v33 }
 0x29a   : > { %v942_v58 = vpop.trf.xlu1 }
 0x29b   : > { %v878_v34 = vpop.trf.xlu0 }
 0x29c   : > { %3630 = vmatmul.mubr.msk.f32.gmra.mrb[10].mxu0 %vm979_vm1, %v878_v34 }
 0x29e   : > { %v943_v60 = vpop.trf.xlu1 }
 0x29f   : > { %v879_v35 = vpop.trf.xlu0 }
 0x2a0   : > { %3632 = vmatprep.mubr.msk.f32.mxu0 %vm979_vm1, %v879_v35 }
 0x2a2   : > { %v944_v62 = vpop.trf.xlu1 }
 0x2a3   : > { %v880_v37 = vpop.trf.xlu0 }
 0x2a4   : > { %3633 = vmatmul.mubr.msk.f32.gmra.mrb[12].mxu0 %vm979_vm1, %v880_v37 }
 0x2a6   : > { %v945_v0 = vpop.trf.xlu1 }
 0x2a7   : > { %v881_v39 = vpop.trf.xlu0 }
 0x2a8   : > { %3635 = vmatprep.mubr.msk.f32.mxu0 %vm979_vm1, %v881_v39 }
 0x2aa   : > { %v946_v2 = vpop.trf.xlu1 }
 0x2ab   : > { %v882_v41 = vpop.trf.xlu0 }
 0x2ac   : > { %3636 = vmatmul.mubr.msk.f32.gmra.mrb[14].mxu0 %vm979_vm1, %v882_v41 }
 0x2ae   : > { %v963_v4 = vpop.trf.xlu1 }
 0x2af   : > { %v899_v43 = vpop.trf.xlu0 }
 0x2b0   : > { %3638 = vmatprep.mubr.msk.f32.mxu0 %vm979_vm1, %v899_v43 }
 0x2b2   : > { %v964_v6 = vpop.trf.xlu1 }
 0x2b3   : > { %v900_v45 = vpop.trf.xlu0 }
 0x2b4   : > { %3639 = vmatmul.mubr.msk.f32.gmra.mrb[16].mxu0 %vm979_vm1, %v900_v45 }
 0x2b6   : > { %v965_v8 = vpop.trf.xlu1 }
 0x2b7   : > { %v901_v47 = vpop.trf.xlu0 }
 0x2b8   : > { %3641 = vmatprep.mubr.msk.f32.mxu0 %vm979_vm1, %v901_v47 }
 0x2ba   : > { %v966_v10 = vpop.trf.xlu1 }
 0x2bb   : > { %v902_v49 = vpop.trf.xlu0 }
 0x2bc   : > { %3642 = vmatmul.mubr.msk.f32.gmra.mrb[18].mxu0 %vm979_vm1, %v902_v49 }
 0x2be   : > { %v967_v11 = vpop.trf.xlu1 }
 0x2bf   : > { %v903_v51 = vpop.trf.xlu0 }
 0x2c0   : > { %3644 = vmatprep.mubr.msk.f32.mxu0 %vm979_vm1, %v903_v51 }
 0x2c2   : > { %v968_v12 = vpop.trf.xlu1 }
 0x2c3   : > { %v904_v53 = vpop.trf.xlu0 }
 0x2c4   : > { %3645 = vmatmul.mubr.msk.f32.gmra.mrb[20].mxu0 %vm979_vm1, %v904_v53 }
 0x2c6   : > { %v969_v13 = vpop.trf.xlu1 }
 0x2c7   : > { %v905_v55 = vpop.trf.xlu0 }
 0x2c8   : > { %3647 = vmatprep.mubr.msk.f32.mxu0 %vm979_vm1, %v905_v55 }
 0x2ca   : > { %v970_v14 = vpop.trf.xlu1 }
 0x2cb   : > { %v906_v57 = vpop.trf.xlu0 }
 0x2cc   : > { %3648 = vmatmul.mubr.msk.f32.gmra.mrb[22].mxu0 %vm979_vm1, %v906_v57 }
 0x2ce   : > { %v971_v15 = vpop.trf.xlu1 }
 0x2cf   : > { %v907_v59 = vpop.trf.xlu0 }
 0x2d0   : > { %3650 = vmatprep.mubr.msk.f32.mxu0 %vm979_vm1, %v907_v59 }
 0x2d2   : > { %v972_v16 = vpop.trf.xlu1 }
 0x2d3   : > { %v908_v61 = vpop.trf.xlu0 }
 0x2d4   : > { %3651 = vmatmul.mubr.msk.f32.gmra.mrb[24].mxu0 %vm979_vm1, %v908_v61 }
 0x2d6   : > { %v973_v17 = vpop.trf.xlu1 }
 0x2d7   : > { %v909_v63 = vpop.trf.xlu0 }
 0x2d8   : > { %3653 = vmatprep.mubr.msk.f32.mxu0 %vm979_vm1, %v909_v63  ;;  %v4958_v63 = vld [vmem:[%s4851_s19] sm:$0xff] }
 0x2da   : > { %v974_v18 = vpop.trf.xlu1 }
 0x2db   : > { %v910_v1 = vpop.trf.xlu0 }
 0x2dc   : > { %3654 = vmatmul.mubr.msk.f32.gmra.mrb[26].mxu0 %vm979_vm1, %v910_v1 }
 0x2de   : > { %v975_v19 = vpop.trf.xlu1 }
 0x2df   : > { %v911_v3 = vpop.trf.xlu0 }
 0x2e0   : > { %3656 = vmatprep.mubr.msk.f32.mxu0 %vm979_vm1, %v911_v3 }
 0x2e2   : > { %v976_v20 = vpop.trf.xlu1 }
 0x2e3   : > { %v912_v5 = vpop.trf.xlu0 }
 0x2e4   : > { %3657 = vmatmul.mubr.msk.f32.gmra.mrb[28].mxu0 %vm979_vm1, %v912_v5 }
 0x2e6   : > { %v977_v21 = vpop.trf.xlu1 }
 0x2e7   : > { %v913_v7 = vpop.trf.xlu0 }
 0x2e8   : > { %3659 = vmatprep.mubr.msk.f32.mxu0 %vm979_vm1, %v913_v7 }
 0x2ea   : > { %v978_v22 = vpop.trf.xlu1 }
 0x2eb   : > { %v914_v9 = vpop.trf.xlu0 }
 0x2ec   : > { %3660 = vmatmul.mubr.msk.f32.gmra.mrb[30].mxu0 %vm979_vm1, %v914_v9 }
 0x2ed   : > { %3662 = vmatprep.mubr.msk.f32.mxu0 %vm979_vm1, %v931_v36 }
 0x2f0   : > { %3663 = vmatmul.mubr.msk.f32.gmra.mrb[32].mxu0 %vm979_vm1, %v932_v38 }
 0x2f1   : > { %3665 = vmatprep.mubr.msk.f32.mxu0 %vm979_vm1, %v933_v40 }
 0x2f4   : > { %3666 = vmatmul.mubr.msk.f32.gmra.mrb[34].mxu0 %vm979_vm1, %v934_v42 }
 0x2f5   : > { %3668 = vmatprep.mubr.msk.f32.mxu0 %vm979_vm1, %v935_v44 }
 0x2f8   : > { %3669 = vmatmul.mubr.msk.f32.gmra.mrb[36].mxu0 %vm979_vm1, %v936_v46 }
 0x2f9   : > { %3671 = vmatprep.mubr.msk.f32.mxu0 %vm979_vm1, %v937_v48 }
 0x2fc   : > { %3672 = vmatmul.mubr.msk.f32.gmra.mrb[38].mxu0 %vm979_vm1, %v938_v50 }
 0x2fd   : > { %3674 = vmatprep.mubr.msk.f32.mxu0 %vm979_vm1, %v939_v52 }
 0x300   : > { %3675 = vmatmul.mubr.msk.f32.gmra.mrb[40].mxu0 %vm979_vm1, %v940_v54 }
 0x301   : > { %3677 = vmatprep.mubr.msk.f32.mxu0 %vm979_vm1, %v941_v56 }
 0x304   : > { %3678 = vmatmul.mubr.msk.f32.gmra.mrb[42].mxu0 %vm979_vm1, %v942_v58 }
 0x305   : > { %3680 = vmatprep.mubr.msk.f32.mxu0 %vm979_vm1, %v943_v60  ;;  %v4955_v60 = vld [vmem:[%s4846_s8] sm:$0xff]  ;;  %s5355_s8 = sld [smem:[#allocation41_spill]] }
 0x308   : > { %3681 = vmatmul.mubr.msk.f32.gmra.mrb[44].mxu0 %vm979_vm1, %v944_v62 }
 0x309   : > { %3683 = vmatprep.mubr.msk.f32.mxu0 %vm979_vm1, %v945_v0 }
 0x30b   : > { %s5356_s19 = scalar_lea.vmem %s5355_s8, %s4836_s6 }
 0x30c   : > { %3684 = vmatmul.mubr.msk.f32.gmra.mrb[46].mxu0 %vm979_vm1, %v946_v2 }
 0x30d   : > { %3686 = vmatprep.mubr.msk.f32.mxu0 %vm979_vm1, %v963_v4 }
 0x310   : > { %3687 = vmatmul.mubr.msk.f32.gmra.mrb[48].mxu0 %vm979_vm1, %v964_v6 }
 0x311   : > { %3689 = vmatprep.mubr.msk.f32.mxu0 %vm979_vm1, %v965_v8  ;;  %v1717_v8 = vld [vmem:[#allocation9] sm:$0xff] }
 0x312   : > { %3710 = vmatprep.subr.msk.mxu1 %vm1846_vm3, %v1717_v8 }
 0x313   : > { %3711 = vmatpush3.xpose.msk.msra.mxu1 %vm1846_vm3, %v1717_v8 }
 0x314   : > { %3690 = vmatmul.mubr.msk.f32.gmra.mrb[50].mxu0 %vm979_vm1, %v966_v10 }
 0x315   : > { %3692 = vmatprep.mubr.msk.f32.mxu0 %vm979_vm1, %v967_v11 }
 0x318   : > { %3693 = vmatmul.mubr.msk.f32.gmra.mrb[52].mxu0 %vm979_vm1, %v968_v12 }
 0x319   : > { %3695 = vmatprep.mubr.msk.f32.mxu0 %vm979_vm1, %v969_v13 }
 0x31c   : > { %3696 = vmatmul.mubr.msk.f32.gmra.mrb[54].mxu0 %vm979_vm1, %v970_v14 }
 0x31d   : > { %3698 = vmatprep.mubr.msk.f32.mxu0 %vm979_vm1, %v971_v15 }
 0x320   : > { %3699 = vmatmul.mubr.msk.f32.gmra.mrb[56].mxu0 %vm979_vm1, %v972_v16 }
 0x321   : > { %3701 = vmatprep.mubr.msk.f32.mxu0 %vm979_vm1, %v973_v17 }
 0x324   : > { %3702 = vmatmul.mubr.msk.f32.gmra.mrb[58].mxu0 %vm979_vm1, %v974_v18 }
 0x325   : > { %3704 = vmatprep.mubr.msk.f32.mxu0 %vm979_vm1, %v975_v19 }
 0x328   : > { %3705 = vmatmul.mubr.msk.f32.gmra.mrb[60].mxu0 %vm979_vm1, %v976_v20 }
 0x329   : > { %3707 = vmatprep.mubr.msk.f32.mxu0 %vm979_vm1, %v977_v21 }
 0x32c   : > { %3708 = vmatmul.mubr.msk.f32.gmra.mrb[62].mxu0 %vm979_vm1, %v978_v22 }
 0x347   : > { %v3616_v23 = vpop.f32.mrb[0].mxu0 }
 0x348   : > { %v1244_v24 = vpop.f32.mrb[1].mxu0 }
 0x349   : > { %1563 = vxpose.xlu0.b32.start [1/16] (narrow) %v1244_v24, 16 }
 0x34d   : > { %1564 = vxpose.xlu0.b32.cont [2/16] (narrow) %v3616_v23, 16 }
 0x34f   : > { %v3619_v25 = vpop.f32.mrb[2].mxu0 }
 0x350   : > { %v1254_v26 = vpop.f32.mrb[3].mxu0 }
 0x351   : > { %1565 = vxpose.xlu0.b32.cont [3/16] (narrow) %v1254_v26, 16 }
 0x355   : > { %1566 = vxpose.xlu0.b32.cont [4/16] (narrow) %v3619_v25, 16 }
 0x357   : > { %v3622_v27 = vpop.f32.mrb[4].mxu0 }
 0x358   : > { %v1264_v28 = vpop.f32.mrb[5].mxu0 }
 0x359   : > { %1567 = vxpose.xlu0.b32.cont [5/16] (narrow) %v1264_v28, 16 }
 0x35d   : > { %1568 = vxpose.xlu0.b32.cont [6/16] (narrow) %v3622_v27, 16 }
 0x35f   : > { %v3625_v29 = vpop.f32.mrb[6].mxu0 }
 0x360   : > { %v1274_v30 = vpop.f32.mrb[7].mxu0 }
 0x361   : > { %1569 = vxpose.xlu0.b32.cont [7/16] (narrow) %v1274_v30, 16 }
 0x365   : > { %1570 = vxpose.xlu0.b32.cont [8/16] (narrow) %v3625_v29, 16 }
 0x367   : > { %v3628_v31 = vpop.f32.mrb[8].mxu0 }
 0x368   : > { %v1284_v32 = vpop.f32.mrb[9].mxu0 }
 0x369   : > { %1571 = vxpose.xlu0.b32.cont [9/16] (narrow) %v1284_v32, 16 }
 0x36d   : > { %1572 = vxpose.xlu0.b32.cont [10/16] (narrow) %v3628_v31, 16 }
 0x36f   : > { %v3631_v33 = vpop.f32.mrb[10].mxu0 }
 0x370   : > { %v1294_v34 = vpop.f32.mrb[11].mxu0 }
 0x371   : > { %1573 = vxpose.xlu0.b32.cont [11/16] (narrow) %v1294_v34, 16 }
 0x375   : > { %1574 = vxpose.xlu0.b32.cont [12/16] (narrow) %v3631_v33, 16 }
 0x377   : > { %v3634_v35 = vpop.f32.mrb[12].mxu0 }
 0x378   : > { %v1304_v36 = vpop.f32.mrb[13].mxu0 }
 0x379   : > { %1575 = vxpose.xlu0.b32.cont [13/16] (narrow) %v1304_v36, 16 }
 0x37d   : > { %1576 = vxpose.xlu0.b32.cont [14/16] (narrow) %v3634_v35, 16 }
 0x37f   : > { %v3637_v37 = vpop.f32.mrb[14].mxu0 }
 0x380   : > { %v1314_v38 = vpop.f32.mrb[15].mxu0 }
 0x381   : > { %1577 = vxpose.xlu0.b32.cont [15/16] (narrow) %v1314_v38, 16 }
 0x385   : > { %1578 = vxpose.xlu0.b32.end [16/16] (narrow) %v3637_v37, 16 }
 0x387   : > { %v3640_v39 = vpop.f32.mrb[16].mxu0 }
 0x388   : > { %v1324_v40 = vpop.f32.mrb[17].mxu0 }
 0x389   : > { %1595 = vxpose.xlu1.b32.start [1/16] (narrow) %v1324_v40, 16 }
 0x38d   : > { %1596 = vxpose.xlu1.b32.cont [2/16] (narrow) %v3640_v39, 16 }
 0x38f   : > { %v3643_v41 = vpop.f32.mrb[18].mxu0 }
 0x390   : > { %v1334_v42 = vpop.f32.mrb[19].mxu0 }
 0x391   : > { %1597 = vxpose.xlu1.b32.cont [3/16] (narrow) %v1334_v42, 16 }
 0x395   : > { %1598 = vxpose.xlu1.b32.cont [4/16] (narrow) %v3643_v41, 16 }
 0x397   : > { %v3646_v43 = vpop.f32.mrb[20].mxu0 }
 0x398   : > { %v1344_v44 = vpop.f32.mrb[21].mxu0 }
 0x399   : > { %1599 = vxpose.xlu1.b32.cont [5/16] (narrow) %v1344_v44, 16 }
 0x39d   : > { %1600 = vxpose.xlu1.b32.cont [6/16] (narrow) %v3646_v43, 16 }
 0x39f   : > { %v3649_v45 = vpop.f32.mrb[22].mxu0 }
 0x3a0   : > { %v1354_v46 = vpop.f32.mrb[23].mxu0 }
 0x3a1   : > { %1601 = vxpose.xlu1.b32.cont [7/16] (narrow) %v1354_v46, 16 }
 0x3a5   : > { %1602 = vxpose.xlu1.b32.cont [8/16] (narrow) %v3649_v45, 16 }
 0x3a7   : > { %v3652_v47 = vpop.f32.mrb[24].mxu0 }
 0x3a8   : > { %v1364_v48 = vpop.f32.mrb[25].mxu0 }
 0x3a9   : > { %1603 = vxpose.xlu1.b32.cont [9/16] (narrow) %v1364_v48, 16 }
 0x3ad   : > { %1604 = vxpose.xlu1.b32.cont [10/16] (narrow) %v3652_v47, 16 }
 0x3af   : > { %v3655_v49 = vpop.f32.mrb[26].mxu0 }
 0x3b0   : > { %v1374_v50 = vpop.f32.mrb[27].mxu0 }
 0x3b1   : > { %1605 = vxpose.xlu1.b32.cont [11/16] (narrow) %v1374_v50, 16 }
 0x3b5   : > { %1606 = vxpose.xlu1.b32.cont [12/16] (narrow) %v3655_v49, 16 }
 0x3b7   : > { %v3658_v51 = vpop.f32.mrb[28].mxu0 }
 0x3b8   : > { %v1384_v52 = vpop.f32.mrb[29].mxu0 }
 0x3b9   : > { %1607 = vxpose.xlu1.b32.cont [13/16] (narrow) %v1384_v52, 16 }
 0x3bd   : > { %1608 = vxpose.xlu1.b32.cont [14/16] (narrow) %v3658_v51, 16 }
 0x3bf   : > { %v3661_v53 = vpop.f32.mrb[30].mxu0 }
 0x3c0   : > { %v1394_v54 = vpop.f32.mrb[31].mxu0 }
 0x3c1   : > { %1609 = vxpose.xlu1.b32.cont [15/16] (narrow) %v1394_v54, 16 }
 0x3c3   : > { %v3664_v55 = vpop.f32.mrb[32].mxu0 }
 0x3c4   : > { %v1404_v56 = vpop.f32.mrb[33].mxu0 }
 0x3c5   : > { %1610 = vxpose.xlu1.b32.end [16/16] (narrow) %v3661_v53, 16 }
 0x3c7   : > { %v3667_v57 = vpop.f32.mrb[34].mxu0 }
 0x3c8   : > { %v1414_v58 = vpop.f32.mrb[35].mxu0 }
 0x3c9   : > { %v1579_v59 = vpop.trf.xlu0  ;;  %1627 = vxpose.xlu1.b32.start [1/16] (narrow) %v1404_v56, 16 }
 0x3ca   : > { %v1693_v1 = vmul.f32 %v4955_v60, %v1579_v59  ;;  %v1705_v7 = vmul.f32 %v4958_v63, %v1579_v59 }
 0x3cb   : > { %v3670_v61 = vpop.f32.mrb[36].mxu0 }
 0x3cc   : > { %v1424_v62 = vpop.f32.mrb[37].mxu0 }
 0x3cd   : > { %v1580_v0 = vpop.trf.xlu0  ;;  %1628 = vxpose.xlu1.b32.cont [2/16] (narrow) %v3664_v55, 16 }
 0x3ce   : > { %v1697_v2 = vmul.f32 %v4958_v63, %v1580_v0  ;;  %v1709_v4 = vmul.f32 %v4955_v60, %v1580_v0 }
 0x3cf   : > { %v3673_v3 = vpop.f32.mrb[38].mxu0 }
 0x3d0   : > { %v1701_v5 = vsub.f32 %v1693_v1, %v1697_v2  ;;  %v1434_v6 = vpop.f32.mrb[39].mxu0  ;;  %v1713_v10 = vadd.f32 %v1709_v4, %v1705_v7 }
 0x3d1   : > { %1629 = vxpose.xlu1.b32.cont [3/16] (narrow) %v1414_v58, 16 }
 0x3d2   : > { %1718 = vxpose.xlu0.b32.start [1/2] (short) %v1701_v5, 128 }
 0x3d3   : > { %v3676_v9 = vpop.f32.mrb[40].mxu0 }
 0x3d4   : > { %v1444_v11 = vpop.f32.mrb[41].mxu0 }
 0x3d5   : > { %1630 = vxpose.xlu1.b32.cont [4/16] (narrow) %v3667_v57, 16 }
 0x3d6   : > { %1719 = vxpose.xlu0.b32.end [2/2] (short) %v1713_v10, 128 }
 0x3d7   : > { %v3679_v12 = vpop.f32.mrb[42].mxu0 }
 0x3d8   : > { %v1454_v13 = vpop.f32.mrb[43].mxu0 }
 0x3d9   : > { %1631 = vxpose.xlu1.b32.cont [5/16] (narrow) %v1424_v62, 16 }
 0x3db   : > { %v3682_v14 = vpop.f32.mrb[44].mxu0 }
 0x3dc   : > { %v1464_v15 = vpop.f32.mrb[45].mxu0 }
 0x3dd   : > { %1632 = vxpose.xlu1.b32.cont [6/16] (narrow) %v3670_v61, 16 }
 0x3df   : > { %v3685_v16 = vpop.f32.mrb[46].mxu0 }
 0x3e0   : > { %v1474_v17 = vpop.f32.mrb[47].mxu0 }
 0x3e1   : > { %1633 = vxpose.xlu1.b32.cont [7/16] (narrow) %v1434_v6, 16 }
 0x3e3   : > { %v3688_v18 = vpop.f32.mrb[48].mxu0 }
 0x3e4   : > { %v1484_v19 = vpop.f32.mrb[49].mxu0 }
 0x3e5   : > { %1634 = vxpose.xlu1.b32.cont [8/16] (narrow) %v3673_v3, 16 }
 0x3e7   : > { %v3691_v20 = vpop.f32.mrb[50].mxu0 }
 0x3e8   : > { %v1494_v21 = vpop.f32.mrb[51].mxu0 }
 0x3e9   : > { %1635 = vxpose.xlu1.b32.cont [9/16] (narrow) %v1444_v11, 16 }
 0x3eb   : > { %v3694_v22 = vpop.f32.mrb[52].mxu0 }
 0x3ec   : > { %v1504_v23 = vpop.f32.mrb[53].mxu0 }
 0x3ed   : > { %1636 = vxpose.xlu1.b32.cont [10/16] (narrow) %v3676_v9, 16 }
 0x3ef   : > { %v3697_v24 = vpop.f32.mrb[54].mxu0 }
 0x3f0   : > { %v1514_v25 = vpop.f32.mrb[55].mxu0 }
 0x3f1   : > { %1637 = vxpose.xlu1.b32.cont [11/16] (narrow) %v1454_v13, 16 }
 0x3f3   : > { %v3700_v26 = vpop.f32.mrb[56].mxu0 }
 0x3f4   : > { %v1524_v27 = vpop.f32.mrb[57].mxu0 }
 0x3f5   : > { %1638 = vxpose.xlu1.b32.cont [12/16] (narrow) %v3679_v12, 16 }
 0x3f7   : > { %v3703_v28 = vpop.f32.mrb[58].mxu0 }
 0x3f8   : > { %v1534_v29 = vpop.f32.mrb[59].mxu0 }
 0x3f9   : > { %1639 = vxpose.xlu1.b32.cont [13/16] (narrow) %v1464_v15, 16 }
 0x3fb   : > { %v3706_v30 = vpop.f32.mrb[60].mxu0 }
 0x3fc   : > { %v1544_v31 = vpop.f32.mrb[61].mxu0 }
 0x3fd   : > { %1640 = vxpose.xlu1.b32.cont [14/16] (narrow) %v3682_v14, 16 }
 0x3ff   : > { %v3709_v32 = vpop.f32.mrb[62].mxu0 }
 0x400   : > { %v1554_v33 = vpop.f32.mrb[63].mxu0 }
 0x401   : > { %1641 = vxpose.xlu1.b32.cont [15/16] (narrow) %v1474_v17, 16 }
 0x405   : > { %1642 = vxpose.xlu1.b32.end [16/16] (narrow) %v3685_v16, 16 }
 0x409   : > { %v1611_v34 = vpop.trf.xlu1  ;;  %1659 = vxpose.xlu1.b32.start [1/16] (narrow) %v1484_v19, 16 }
 0x40a   : > { %v1694_v36 = vmul.f32 %v4955_v60, %v1611_v34  ;;  %v1706_v40 = vmul.f32 %v4958_v63, %v1611_v34 }
 0x40d   : > { %v1612_v35 = vpop.trf.xlu1  ;;  %1660 = vxpose.xlu1.b32.cont [2/16] (narrow) %v3688_v18, 16 }
 0x40e   : > { %v1698_v37 = vmul.f32 %v4958_v63, %v1612_v35  ;;  %v1710_v39 = vmul.f32 %v4955_v60, %v1612_v35 }
 0x410   : > { %v1702_v38 = vsub.f32 %v1694_v36, %v1698_v37  ;;  %v1714_v41 = vadd.f32 %v1710_v39, %v1706_v40 }
 0x411   : > { %1661 = vxpose.xlu1.b32.cont [3/16] (narrow) %v1494_v21, 16 }
 0x412   : > { %1750 = vxpose.xlu0.b32.start [1/2] (short) %v1702_v38, 128 }
 0x415   : > { %1662 = vxpose.xlu1.b32.cont [4/16] (narrow) %v3691_v20, 16 }
 0x416   : > { %1751 = vxpose.xlu0.b32.end [2/2] (short) %v1714_v41, 128 }
 0x419   : > { %1663 = vxpose.xlu1.b32.cont [5/16] (narrow) %v1504_v23, 16 }
 0x41d   : > { %1664 = vxpose.xlu1.b32.cont [6/16] (narrow) %v3694_v22, 16 }
 0x421   : > { %1665 = vxpose.xlu1.b32.cont [7/16] (narrow) %v1514_v25, 16 }
 0x425   : > { %1666 = vxpose.xlu1.b32.cont [8/16] (narrow) %v3697_v24, 16 }
 0x429   : > { %1667 = vxpose.xlu1.b32.cont [9/16] (narrow) %v1524_v27, 16 }
 0x42d   : > { %1668 = vxpose.xlu1.b32.cont [10/16] (narrow) %v3700_v26, 16 }
 0x431   : > { %1669 = vxpose.xlu1.b32.cont [11/16] (narrow) %v1534_v29, 16 }
 0x435   : > { %1670 = vxpose.xlu1.b32.cont [12/16] (narrow) %v3703_v28, 16 }
 0x439   : > { %1671 = vxpose.xlu1.b32.cont [13/16] (narrow) %v1544_v31, 16 }
 0x43d   : > { %1672 = vxpose.xlu1.b32.cont [14/16] (narrow) %v3706_v30, 16 }
 0x441   : > { %1673 = vxpose.xlu1.b32.cont [15/16] (narrow) %v1554_v33, 16 }
 0x445   : > { %1674 = vxpose.xlu1.b32.end [16/16] (narrow) %v3709_v32, 16 }
 0x449   : > { %v1643_v42 = vpop.trf.xlu1 }
 0x44a   : > { %v1695_v43 = vmul.f32 %v4955_v60, %v1643_v42  ;;  %v1707_v45 = vmul.f32 %v4958_v63, %v1643_v42 }
 0x44d   : > { %v1644_v44 = vpop.trf.xlu1 }
 0x44e   : > { %v1699_v46 = vmul.f32 %v4958_v63, %v1644_v44  ;;  %v1711_v47 = vmul.f32 %v4955_v60, %v1644_v44 }
 0x450   : > { %v1703_v48 = vsub.f32 %v1695_v43, %v1699_v46  ;;  %v1715_v50 = vadd.f32 %v1711_v47, %v1707_v45 }
 0x452   : > { %v1734_v49 = vpop.trf.xlu0  ;;  %1782 = vxpose.xlu0.b32.start [1/2] (short) %v1703_v48, 128 }
 0x453   : > { %3712 = vmatprep.mubr.msk.f32.mxu1 %vm1846_vm3, %v1734_v49 }
 0x456   : > { %v1735_v51 = vpop.trf.xlu0  ;;  %1783 = vxpose.xlu0.b32.end [2/2] (short) %v1715_v50, 128 }
 0x457   : > { %3713 = vmatmul.mubr.msk.f32.vlgmr.msra.gmra.mrb[0].mxu1 %vm1846_vm3, %v1735_v51 }
 0x45a   : > { %v1736_v52 = vpop.trf.xlu0 }
 0x45b   : > { %3715 = vmatprep.mubr.msk.f32.mxu1 %vm1846_vm3, %v1736_v52 }
 0x45e   : > { %v1737_v53 = vpop.trf.xlu0 }
 0x45f   : > { %3716 = vmatmul.mubr.msk.f32.gmra.mrb[2].mxu1 %vm1846_vm3, %v1737_v53 }
 0x462   : > { %v1738_v54 = vpop.trf.xlu0 }
 0x463   : > { %3718 = vmatprep.mubr.msk.f32.mxu1 %vm1846_vm3, %v1738_v54 }
 0x466   : > { %v1739_v55 = vpop.trf.xlu0 }
 0x467   : > { %3719 = vmatmul.mubr.msk.f32.gmra.mrb[4].mxu1 %vm1846_vm3, %v1739_v55 }
 0x46a   : > { %v1740_v56 = vpop.trf.xlu0 }
 0x46b   : > { %3721 = vmatprep.mubr.msk.f32.mxu1 %vm1846_vm3, %v1740_v56 }
 0x46e   : > { %v1741_v57 = vpop.trf.xlu0 }
 0x46f   : > { %3722 = vmatmul.mubr.msk.f32.gmra.mrb[6].mxu1 %vm1846_vm3, %v1741_v57 }
 0x472   : > { %v1742_v58 = vpop.trf.xlu0 }
 0x473   : > { %3724 = vmatprep.mubr.msk.f32.mxu1 %vm1846_vm3, %v1742_v58 }
 0x476   : > { %v1743_v59 = vpop.trf.xlu0 }
 0x477   : > { %3725 = vmatmul.mubr.msk.f32.gmra.mrb[8].mxu1 %vm1846_vm3, %v1743_v59 }
 0x47a   : > { %v1744_v61 = vpop.trf.xlu0 }
 0x47b   : > { %3727 = vmatprep.mubr.msk.f32.mxu1 %vm1846_vm3, %v1744_v61 }
 0x47e   : > { %v1745_v62 = vpop.trf.xlu0 }
 0x47f   : > { %3728 = vmatmul.mubr.msk.f32.gmra.mrb[10].mxu1 %vm1846_vm3, %v1745_v62 }
 0x482   : > { %v1746_v0 = vpop.trf.xlu0 }
 0x483   : > { %3730 = vmatprep.mubr.msk.f32.mxu1 %vm1846_vm3, %v1746_v0 }
 0x486   : > { %v1747_v1 = vpop.trf.xlu0 }
 0x487   : > { %3731 = vmatmul.mubr.msk.f32.gmra.mrb[12].mxu1 %vm1846_vm3, %v1747_v1 }
 0x489   : > { %v1675_v2 = vpop.trf.xlu1 }
 0x48a   : > { %v1748_v3 = vpop.trf.xlu0  ;;  %v1696_v4 = vmul.f32 %v4955_v60, %v1675_v2  ;;  %v1708_v7 = vmul.f32 %v4958_v63, %v1675_v2 }
 0x48b   : > { %3733 = vmatprep.mubr.msk.f32.mxu1 %vm1846_vm3, %v1748_v3 }
 0x48d   : > { %v1676_v5 = vpop.trf.xlu1 }
 0x48e   : > { %v1749_v6 = vpop.trf.xlu0  ;;  %v1700_v8 = vmul.f32 %v4958_v63, %v1676_v5  ;;  %v1712_v9 = vmul.f32 %v4955_v60, %v1676_v5 }
 0x48f   : > { %3734 = vmatmul.mubr.msk.f32.gmra.mrb[14].mxu1 %vm1846_vm3, %v1749_v6 }
 0x490   : > { %v1704_v10 = vsub.f32 %v1696_v4, %v1700_v8  ;;  %v1716_v12 = vadd.f32 %v1712_v9, %v1708_v7 }
 0x492   : > { %v1766_v11 = vpop.trf.xlu0  ;;  %1814 = vxpose.xlu1.b32.start [1/2] (short) %v1704_v10, 128 }
 0x493   : > { %3736 = vmatprep.mubr.msk.f32.mxu1 %vm1846_vm3, %v1766_v11 }
 0x496   : > { %v1767_v13 = vpop.trf.xlu0  ;;  %1815 = vxpose.xlu1.b32.end [2/2] (short) %v1716_v12, 128 }
 0x497   : > { %3737 = vmatmul.mubr.msk.f32.gmra.mrb[16].mxu1 %vm1846_vm3, %v1767_v13 }
 0x49a   : > { %v1768_v14 = vpop.trf.xlu0 }
 0x49b   : > { %3739 = vmatprep.mubr.msk.f32.mxu1 %vm1846_vm3, %v1768_v14 }
 0x49e   : > { %v1769_v15 = vpop.trf.xlu0 }
 0x49f   : > { %3740 = vmatmul.mubr.msk.f32.gmra.mrb[18].mxu1 %vm1846_vm3, %v1769_v15 }
 0x4a2   : > { %v1770_v63 = vpop.trf.xlu0 }
 0x4a3   : > { %3742 = vmatprep.mubr.msk.f32.mxu1 %vm1846_vm3, %v1770_v63 }
 0x4a6   : > { %v1771_v60 = vpop.trf.xlu0 }
 0x4a7   : > { %3743 = vmatmul.mubr.msk.f32.gmra.mrb[20].mxu1 %vm1846_vm3, %v1771_v60 }
 0x4aa   : > { %v1772_v16 = vpop.trf.xlu0 }
 0x4ab   : > { %3745 = vmatprep.mubr.msk.f32.mxu1 %vm1846_vm3, %v1772_v16 }
 0x4ae   : > { %v1773_v17 = vpop.trf.xlu0 }
 0x4af   : > { %3746 = vmatmul.mubr.msk.f32.gmra.mrb[22].mxu1 %vm1846_vm3, %v1773_v17 }
 0x4b2   : > { %v1774_v18 = vpop.trf.xlu0 }
 0x4b3   : > { %3748 = vmatprep.mubr.msk.f32.mxu1 %vm1846_vm3, %v1774_v18 }
 0x4b6   : > { %v1775_v19 = vpop.trf.xlu0 }
 0x4b7   : > { %3749 = vmatmul.mubr.msk.f32.gmra.mrb[24].mxu1 %vm1846_vm3, %v1775_v19 }
 0x4ba   : > { %v1776_v20 = vpop.trf.xlu0 }
 0x4bb   : > { %3751 = vmatprep.mubr.msk.f32.mxu1 %vm1846_vm3, %v1776_v20 }
 0x4be   : > { %v1777_v21 = vpop.trf.xlu0 }
 0x4bf   : > { %3752 = vmatmul.mubr.msk.f32.gmra.mrb[26].mxu1 %vm1846_vm3, %v1777_v21 }
 0x4c2   : > { %v1778_v22 = vpop.trf.xlu0 }
 0x4c3   : > { %3754 = vmatprep.mubr.msk.f32.mxu1 %vm1846_vm3, %v1778_v22 }
 0x4c6   : > { %v1779_v23 = vpop.trf.xlu0 }
 0x4c7   : > { %3755 = vmatmul.mubr.msk.f32.gmra.mrb[28].mxu1 %vm1846_vm3, %v1779_v23 }
 0x4ca   : > { %v1780_v24 = vpop.trf.xlu0 }
 0x4cb   : > { %3757 = vmatprep.mubr.msk.f32.mxu1 %vm1846_vm3, %v1780_v24 }
 0x4ce   : > { %v1781_v25 = vpop.trf.xlu0 }
 0x4cf   : > { %3758 = vmatmul.mubr.msk.f32.gmra.mrb[30].mxu1 %vm1846_vm3, %v1781_v25 }
 0x4d2   : > { %v1798_v26 = vpop.trf.xlu0 }
 0x4d3   : > { %3760 = vmatprep.mubr.msk.f32.mxu1 %vm1846_vm3, %v1798_v26 }
 0x4d6   : > { %v1799_v27 = vpop.trf.xlu0 }
 0x4d7   : > { %3761 = vmatmul.mubr.msk.f32.gmra.mrb[32].mxu1 %vm1846_vm3, %v1799_v27 }
 0x4da   : > { %v1800_v28 = vpop.trf.xlu0 }
 0x4db   : > { %3763 = vmatprep.mubr.msk.f32.mxu1 %vm1846_vm3, %v1800_v28 }
 0x4de   : > { %v1801_v29 = vpop.trf.xlu0 }
 0x4df   : > { %3764 = vmatmul.mubr.msk.f32.gmra.mrb[34].mxu1 %vm1846_vm3, %v1801_v29  ;;  %v4045_v29 = vld [vmem:[#allocation2] sm:$0xff] }
 0x4e2   : > { %v1802_v30 = vpop.trf.xlu0 }
 0x4e3   : > { %3766 = vmatprep.mubr.msk.f32.mxu1 %vm1846_vm3, %v1802_v30 }
 0x4e6   : > { %v1803_v31 = vpop.trf.xlu0 }
 0x4e7   : > { %3767 = vmatmul.mubr.msk.f32.gmra.mrb[36].mxu1 %vm1846_vm3, %v1803_v31 }
 0x4ea   : > { %v1804_v32 = vpop.trf.xlu0 }
 0x4eb   : > { %3769 = vmatprep.mubr.msk.f32.mxu1 %vm1846_vm3, %v1804_v32 }
 0x4ee   : > { %v1805_v33 = vpop.trf.xlu0 }
 0x4ef   : > { %3770 = vmatmul.mubr.msk.f32.gmra.mrb[38].mxu1 %vm1846_vm3, %v1805_v33 }
 0x4f2   : > { %v1806_v34 = vpop.trf.xlu0 }
 0x4f3   : > { %3772 = vmatprep.mubr.msk.f32.mxu1 %vm1846_vm3, %v1806_v34 }
 0x4f6   : > { %v1807_v35 = vpop.trf.xlu0 }
 0x4f7   : > { %3773 = vmatmul.mubr.msk.f32.gmra.mrb[40].mxu1 %vm1846_vm3, %v1807_v35 }
 0x4fa   : > { %v1808_v36 = vpop.trf.xlu0 }
 0x4fb   : > { %3775 = vmatprep.mubr.msk.f32.mxu1 %vm1846_vm3, %v1808_v36 }
 0x4fe   : > { %v1809_v37 = vpop.trf.xlu0 }
 0x4ff   : > { %3776 = vmatmul.mubr.msk.f32.gmra.mrb[42].mxu1 %vm1846_vm3, %v1809_v37 }
 0x502   : > { %v1810_v38 = vpop.trf.xlu0 }
 0x503   : > { %3778 = vmatprep.mubr.msk.f32.mxu1 %vm1846_vm3, %v1810_v38 }
 0x506   : > { %v1811_v39 = vpop.trf.xlu0 }
 0x507   : > { %3779 = vmatmul.mubr.msk.f32.gmra.mrb[44].mxu1 %vm1846_vm3, %v1811_v39 }
 0x50a   : > { %v1812_v40 = vpop.trf.xlu0 }
 0x50b   : > { %3781 = vmatprep.mubr.msk.f32.mxu1 %vm1846_vm3, %v1812_v40 }
 0x50e   : > { %v1813_v41 = vpop.trf.xlu0 }
 0x50f   : > { %3782 = vmatmul.mubr.msk.f32.gmra.mrb[46].mxu1 %vm1846_vm3, %v1813_v41 }
 0x512   : > { %v1830_v42 = vpop.trf.xlu1 }
 0x513   : > { %3784 = vmatprep.mubr.msk.f32.mxu1 %vm1846_vm3, %v1830_v42 }
 0x516   : > { %v1831_v43 = vpop.trf.xlu1 }
 0x517   : > { %3785 = vmatmul.mubr.msk.f32.gmra.mrb[48].mxu1 %vm1846_vm3, %v1831_v43 }
 0x51a   : > { %v1832_v44 = vpop.trf.xlu1 }
 0x51b   : > { %3787 = vmatprep.mubr.msk.f32.mxu1 %vm1846_vm3, %v1832_v44 }
 0x51e   : > { %v1833_v45 = vpop.trf.xlu1 }
 0x51f   : > { %3788 = vmatmul.mubr.msk.f32.gmra.mrb[50].mxu1 %vm1846_vm3, %v1833_v45 }
 0x522   : > { %v1834_v46 = vpop.trf.xlu1 }
 0x523   : > { %3790 = vmatprep.mubr.msk.f32.mxu1 %vm1846_vm3, %v1834_v46 }
 0x526   : > { %v1835_v47 = vpop.trf.xlu1 }
 0x527   : > { %3791 = vmatmul.mubr.msk.f32.gmra.mrb[52].mxu1 %vm1846_vm3, %v1835_v47 }
 0x52a   : > { %v3714_v48 = vpop.f32.mrb[0].mxu1  ;;  %v1836_v49 = vpop.trf.xlu1 }
 0x52b   : > { %v2108_v50 = vpop.f32.mrb[1].mxu1  ;;  %3793 = vmatprep.mubr.msk.f32.mxu1 %vm1846_vm3, %v1836_v49  ;;  %v4046_v49 = vld [vmem:[#allocation2 + $0x8] sm:$0xff] }
 0x52c   : > { %2427 = vxpose.xlu0.b32.start [1/16] (narrow) %v2108_v50, 8 }
 0x52e   : > { %v1837_v51 = vpop.trf.xlu1 }
 0x52f   : > { %3794 = vmatmul.mubr.msk.f32.gmra.mrb[54].mxu1 %vm1846_vm3, %v1837_v51 }
 0x530   : > { %2428 = vxpose.xlu0.b32.cont [2/16] (narrow) %v3714_v48, 8 }
 0x532   : > { %v3717_v52 = vpop.f32.mrb[2].mxu1  ;;  %v1838_v53 = vpop.trf.xlu1 }
 0x533   : > { %v2118_v54 = vpop.f32.mrb[3].mxu1  ;;  %3796 = vmatprep.mubr.msk.f32.mxu1 %vm1846_vm3, %v1838_v53 }
 0x534   : > { %2429 = vxpose.xlu0.b32.cont [3/16] (narrow) %v2118_v54, 8 }
 0x536   : > { %v1839_v55 = vpop.trf.xlu1 }
 0x537   : > { %3797 = vmatmul.mubr.msk.f32.gmra.mrb[56].mxu1 %vm1846_vm3, %v1839_v55 }
 0x538   : > { %2430 = vxpose.xlu0.b32.cont [4/16] (narrow) %v3717_v52, 8 }
 0x53a   : > { %v3720_v56 = vpop.f32.mrb[4].mxu1  ;;  %v1840_v57 = vpop.trf.xlu1 }
 0x53b   : > { %v2128_v58 = vpop.f32.mrb[5].mxu1  ;;  %3799 = vmatprep.mubr.msk.f32.mxu1 %vm1846_vm3, %v1840_v57 }
 0x53c   : > { %2431 = vxpose.xlu0.b32.cont [5/16] (narrow) %v2128_v58, 8 }
 0x53e   : > { %v1841_v59 = vpop.trf.xlu1 }
 0x53f   : > { %3800 = vmatmul.mubr.msk.f32.gmra.mrb[58].mxu1 %vm1846_vm3, %v1841_v59 }
 0x540   : > { %2432 = vxpose.xlu0.b32.cont [6/16] (narrow) %v3720_v56, 8 }
 0x542   : > { %v3723_v61 = vpop.f32.mrb[6].mxu1  ;;  %v1842_v62 = vpop.trf.xlu1 }
 0x543   : > { %v2138_v0 = vpop.f32.mrb[7].mxu1  ;;  %3802 = vmatprep.mubr.msk.f32.mxu1 %vm1846_vm3, %v1842_v62 }
 0x544   : > { %2433 = vxpose.xlu0.b32.cont [7/16] (narrow) %v2138_v0, 8 }
 0x546   : > { %v1843_v1 = vpop.trf.xlu1 }
 0x547   : > { %3803 = vmatmul.mubr.msk.f32.gmra.mrb[60].mxu1 %vm1846_vm3, %v1843_v1 }
 0x548   : > { %2434 = vxpose.xlu0.b32.cont [8/16] (narrow) %v3723_v61, 8 }
 0x54a   : > { %v3726_v2 = vpop.f32.mrb[8].mxu1  ;;  %v1844_v3 = vpop.trf.xlu1 }
 0x54b   : > { %v2148_v4 = vpop.f32.mrb[9].mxu1  ;;  %3805 = vmatprep.mubr.msk.f32.mxu1 %vm1846_vm3, %v1844_v3 }
 0x54c   : > { %2435 = vxpose.xlu0.b32.cont [9/16] (narrow) %v2148_v4, 8  ;;  %v4005_v4 = vld [vmem:[%s4828_s1] sm:$0xff]  }
 0x54d   : > { %3808 = vmatprep.subr.bf16.mxu1 %v4005_v4 }
 0x54e   : > { %v1845_v5 = vpop.trf.xlu1  ;;  %3809 = vmatpush3.bf16.msra.mxu1 %v4005_v4 }
 0x54f   : > { %3806 = vmatmul.mubr.msk.f32.gmra.mrb[62].mxu1 %vm1846_vm3, %v1845_v5  ;;  %v4006_v5 = vld [vmem:[%s4828_s1 + $0x8] sm:$0xff]  }
 0x550   : > { %2436 = vxpose.xlu0.b32.cont [10/16] (narrow) %v3726_v2, 8  ;;  %3810 = vmatprep.subr.bf16.mxu1 %v4006_v5 }
 0x552   : > { %v3729_v6 = vpop.f32.mrb[10].mxu1  ;;  %3811 = vmatpush3.bf16.msra.mxu1 %v4006_v5 }
 0x553   : > { %v2158_v7 = vpop.f32.mrb[11].mxu1 }
 0x554   : > { %2437 = vxpose.xlu0.b32.cont [11/16] (narrow) %v2158_v7, 8 }
 0x558   : > { %2438 = vxpose.xlu0.b32.cont [12/16] (narrow) %v3729_v6, 8 }
 0x55a   : > { %v3732_v8 = vpop.f32.mrb[12].mxu1 }
 0x55b   : > { %v2168_v9 = vpop.f32.mrb[13].mxu1 }
 0x55c   : > { %2439 = vxpose.xlu0.b32.cont [13/16] (narrow) %v2168_v9, 8  ;;  %v4047_v9 = vld [vmem:[#allocation2 + $0x10] sm:$0xff] }
 0x560   : > { %2440 = vxpose.xlu0.b32.cont [14/16] (narrow) %v3732_v8, 8 }
 0x562   : > { %v3735_v10 = vpop.f32.mrb[14].mxu1 }
 0x563   : > { %v2178_v11 = vpop.f32.mrb[15].mxu1 }
 0x564   : > { %2441 = vxpose.xlu0.b32.cont [15/16] (narrow) %v2178_v11, 8 }
 0x568   : > { %2442 = vxpose.xlu0.b32.end [16/16] (narrow) %v3735_v10, 8 }
 0x56a   : > { %v3738_v12 = vpop.f32.mrb[16].mxu1 }
 0x56b   : > { %v2188_v13 = vpop.f32.mrb[17].mxu1 }
 0x56c   : > { %2459 = vxpose.xlu1.b32.start [1/16] (narrow) %v2188_v13, 8 }
 0x570   : > { %2460 = vxpose.xlu1.b32.cont [2/16] (narrow) %v3738_v12, 8 }
 0x572   : > { %v3741_v14 = vpop.f32.mrb[18].mxu1 }
 0x573   : > { %v2198_v15 = vpop.f32.mrb[19].mxu1 }
 0x574   : > { %2461 = vxpose.xlu1.b32.cont [3/16] (narrow) %v2198_v15, 8 }
 0x578   : > { %2462 = vxpose.xlu1.b32.cont [4/16] (narrow) %v3741_v14, 8 }
 0x57a   : > { %v3744_v63 = vpop.f32.mrb[20].mxu1 }
 0x57b   : > { %v2208_v60 = vpop.f32.mrb[21].mxu1 }
 0x57c   : > { %2463 = vxpose.xlu1.b32.cont [5/16] (narrow) %v2208_v60, 8 }
 0x580   : > { %2464 = vxpose.xlu1.b32.cont [6/16] (narrow) %v3744_v63, 8 }
 0x582   : > { %v3747_v16 = vpop.f32.mrb[22].mxu1 }
 0x583   : > { %v2218_v17 = vpop.f32.mrb[23].mxu1 }
 0x584   : > { %2465 = vxpose.xlu1.b32.cont [7/16] (narrow) %v2218_v17, 8 }
 0x588   : > { %2466 = vxpose.xlu1.b32.cont [8/16] (narrow) %v3747_v16, 8 }
 0x58a   : > { %v3750_v18 = vpop.f32.mrb[24].mxu1 }
 0x58b   : > { %v2228_v19 = vpop.f32.mrb[25].mxu1 }
 0x58c   : > { %2467 = vxpose.xlu1.b32.cont [9/16] (narrow) %v2228_v19, 8 }
 0x590   : > { %2468 = vxpose.xlu1.b32.cont [10/16] (narrow) %v3750_v18, 8 }
 0x592   : > { %v3753_v20 = vpop.f32.mrb[26].mxu1 }
 0x593   : > { %v2238_v21 = vpop.f32.mrb[27].mxu1 }
 0x594   : > { %2469 = vxpose.xlu1.b32.cont [11/16] (narrow) %v2238_v21, 8 }
 0x598   : > { %2470 = vxpose.xlu1.b32.cont [12/16] (narrow) %v3753_v20, 8 }
 0x59a   : > { %v3756_v22 = vpop.f32.mrb[28].mxu1 }
 0x59b   : > { %v2248_v23 = vpop.f32.mrb[29].mxu1 }
 0x59c   : > { %2471 = vxpose.xlu1.b32.cont [13/16] (narrow) %v2248_v23, 8 }
 0x5a0   : > { %2472 = vxpose.xlu1.b32.cont [14/16] (narrow) %v3756_v22, 8 }
 0x5a2   : > { %v3759_v24 = vpop.f32.mrb[30].mxu1 }
 0x5a3   : > { %v2258_v25 = vpop.f32.mrb[31].mxu1 }
 0x5a4   : > { %2473 = vxpose.xlu1.b32.cont [15/16] (narrow) %v2258_v25, 8  ;;  %v4008_v25 = vld [vmem:[%s4828_s1 + $0x18] sm:$0xff]  }
 0x5a8   : > { %2474 = vxpose.xlu1.b32.end [16/16] (narrow) %v3759_v24, 8  ;;  %v4007_v24 = vld [vmem:[%s4828_s1 + $0x10] sm:$0xff]  }
 0x5a9   : > { %3812 = vmatprep.subr.bf16.mxu1 %v4007_v24 }
 0x5aa   : > { %v3762_v26 = vpop.f32.mrb[32].mxu1  ;;  %3813 = vmatpush3.bf16.msra.mxu1 %v4007_v24 }
 0x5ab   : > { %v2268_v27 = vpop.f32.mrb[33].mxu1  ;;  %3814 = vmatprep.subr.bf16.mxu1 %v4008_v25 }
 0x5ac   : > { %v2443_v28 = vpop.trf.xlu0 }
 0x5ad   : > { %v5042_v30 = vadd.f32 %v4045_v29, %v2443_v28 }
 0x5ae   : > { %3815 = vmatpush3.bf16.msra.mxu1 %v4008_v25 }
 0x5af   : > { %2561 = vadd.xlane.f32.xlu0 %v5042_v30  ;;  %v2573_v31 = vmul.f32 %v5042_v30, %v5042_v30 }
 0x5b2   : > { %v3765_v32 = vpop.f32.mrb[34].mxu1 }
 0x5b3   : > { %2577 = vadd.xlane.f32.xlu0 %v2573_v31  ;;  %v2278_v33 = vpop.f32.mrb[35].mxu1  ;;  %v4010_v31 = vld [vmem:[%s4828_s1 + $0x28] sm:$0xff]  }
 0x5ba   : > { %v3768_v34 = vpop.f32.mrb[36].mxu1 }
 0x5bb   : > { %v2288_v35 = vpop.f32.mrb[37].mxu1 }
 0x5c2   : > { %v3771_v36 = vpop.f32.mrb[38].mxu1 }
 0x5c3   : > { %v2298_v37 = vpop.f32.mrb[39].mxu1 }
 0x5ca   : > { %v3774_v38 = vpop.f32.mrb[40].mxu1 }
 0x5cb   : > { %v2308_v39 = vpop.f32.mrb[41].mxu1 }
 0x5d2   : > { %v3777_v40 = vpop.f32.mrb[42].mxu1 }
 0x5d3   : > { %v2318_v41 = vpop.f32.mrb[43].mxu1 }
 0x5da   : > { %v3780_v42 = vpop.f32.mrb[44].mxu1 }
 0x5db   : > { %v2328_v43 = vpop.f32.mrb[45].mxu1 }
 0x5e0   : > { %2491 = vxpose.xlu0.b32.start [1/16] (narrow) %v2268_v27, 8 }
 0x5e2   : > { %v3783_v44 = vpop.f32.mrb[46].mxu1 }
 0x5e3   : > { %v2338_v45 = vpop.f32.mrb[47].mxu1 }
 0x5e4   : > { %2492 = vxpose.xlu0.b32.cont [2/16] (narrow) %v3762_v26, 8  ;;  %v4009_v26 = vld [vmem:[%s4828_s1 + $0x20] sm:$0xff]  }
 0x5e5   : > { %3816 = vmatprep.subr.bf16.mxu1 %v4009_v26 }
 0x5e6   : > { %3817 = vmatpush3.bf16.msra.mxu1 %v4009_v26 }
 0x5e7   : > { %3818 = vmatprep.subr.bf16.mxu1 %v4010_v31 }
 0x5e8   : > { %2493 = vxpose.xlu0.b32.cont [3/16] (narrow) %v2278_v33, 8 }
 0x5ea   : > { %v3786_v46 = vpop.f32.mrb[48].mxu1  ;;  %3819 = vmatpush3.bf16.msra.mxu1 %v4010_v31 }
 0x5eb   : > { %v2348_v47 = vpop.f32.mrb[49].mxu1 }
 0x5ec   : > { %v2475_v48 = vpop.trf.xlu1  ;;  %2494 = vxpose.xlu0.b32.cont [4/16] (narrow) %v3765_v32, 8  ;;  %v5069_v32 = vld [vmem:[%s5356_s19] ss:$0 sm:$0xff] }
 0x5ed   : > { %v5047_v50 = vadd.f32 %v4046_v49, %v2475_v48  ;;  %v4014_v48 = vld [vmem:[%s4873_s0 + $0x8] sm:$0xff]   ;;  %v4015_v49 = vld [vmem:[%s4873_s0 + $0x10] sm:$0xff]  }
 0x5ef   : > { %2563 = vadd.xlane.f32.xlu1 %v5047_v50  ;;  %v2574_v51 = vmul.f32 %v5047_v50, %v5047_v50 }
 0x5f0   : > { %2495 = vxpose.xlu0.b32.cont [5/16] (narrow) %v2288_v35, 8 }
 0x5f2   : > { %v3789_v52 = vpop.f32.mrb[50].mxu1 }
 0x5f3   : > { %2579 = vadd.xlane.f32.xlu1 %v2574_v51  ;;  %v2358_v53 = vpop.f32.mrb[51].mxu1  ;;  %v4017_v51 = vld [vmem:[%s4873_s0 + $0x20] sm:$0xff]  }
 0x5f4   : > { %2496 = vxpose.xlu0.b32.cont [6/16] (narrow) %v3768_v34, 8 }
 0x5f8   : > { %2497 = vxpose.xlu0.b32.cont [7/16] (narrow) %v2298_v37, 8  ;;  %v4011_v37 = vld [vmem:[%s4828_s1 + $0x30] sm:$0xff]  }
 0x5f9   : > { %3820 = vmatprep.subr.bf16.mxu1 %v4011_v37 }
 0x5fa   : > { %v3792_v54 = vpop.f32.mrb[52].mxu1  ;;  %3821 = vmatpush3.bf16.msra.mxu1 %v4011_v37 }
 0x5fb   : > { %v2368_v55 = vpop.f32.mrb[53].mxu1 }
 0x5fc   : > { %2498 = vxpose.xlu0.b32.cont [8/16] (narrow) %v3771_v36, 8 }
 0x600   : > { %2499 = vxpose.xlu0.b32.cont [9/16] (narrow) %v2308_v39, 8 }
 0x602   : > { %v3795_v56 = vpop.f32.mrb[54].mxu1 }
 0x603   : > { %v2378_v57 = vpop.f32.mrb[55].mxu1 }
 0x604   : > { %2500 = vxpose.xlu0.b32.cont [10/16] (narrow) %v3774_v38, 8 }
 0x608   : > { %2501 = vxpose.xlu0.b32.cont [11/16] (narrow) %v2318_v41, 8 }
 0x60a   : > { %v3798_v58 = vpop.f32.mrb[56].mxu1 }
 0x60b   : > { %v2388_v59 = vpop.f32.mrb[57].mxu1 }
 0x60c   : > { %2502 = vxpose.xlu0.b32.cont [12/16] (narrow) %v3777_v40, 8 }
 0x610   : > { %2503 = vxpose.xlu0.b32.cont [13/16] (narrow) %v2328_v43, 8  ;;  %v4048_v43 = vld [vmem:[#allocation2 + $0x18] sm:$0xff] }
 0x612   : > { %v3801_v61 = vpop.f32.mrb[58].mxu1 }
 0x613   : > { %v2398_v62 = vpop.f32.mrb[59].mxu1 }
 0x614   : > { %2504 = vxpose.xlu0.b32.cont [14/16] (narrow) %v3780_v42, 8 }
 0x618   : > { %2505 = vxpose.xlu0.b32.cont [15/16] (narrow) %v2338_v45, 8 }
 0x61a   : > { %v3804_v0 = vpop.f32.mrb[60].mxu1 }
 0x61b   : > { %v2408_v1 = vpop.f32.mrb[61].mxu1 }
 0x61c   : > { %2506 = vxpose.xlu0.b32.end [16/16] (narrow) %v3783_v44, 8 }
 0x622   : > { %v3807_v2 = vpop.f32.mrb[62].mxu1 }
 0x623   : > { %v2418_v3 = vpop.f32.mrb[63].mxu1 }
 0x626   : > { %2523 = vxpose.xlu1.b32.start [1/16] (narrow) %v2348_v47, 8  ;;  %v4013_v47 = vld [vmem:[%s4873_s0] sm:$0xff]  }
 0x627   : > { %3828 = vmatprep.subr.bf16.mxu0 %v4013_v47 }
 0x628   : > { %3829 = vmatpush3.bf16.msra.mxu0 %v4013_v47 }
 0x629   : > { %3830 = vmatprep.subr.bf16.mxu0 %v4014_v48 }
 0x62a   : > { %2524 = vxpose.xlu1.b32.cont [2/16] (narrow) %v3786_v46, 8  ;;  %v4012_v46 = vld [vmem:[%s4828_s1 + $0x38] sm:$0xff]  }
 0x62b   : > { %3822 = vmatprep.subr.bf16.mxu1 %v4012_v46 }
 0x62c   : > { %3823 = vmatpush3.bf16.msra.mxu1 %v4012_v46  ;;  %3831 = vmatpush3.bf16.msra.mxu0 %v4014_v48 }
 0x62d   : > { %3832 = vmatprep.subr.bf16.mxu0 %v4015_v49 }
 0x62e   : > { %2525 = vxpose.xlu1.b32.cont [3/16] (narrow) %v2358_v53, 8 }
 0x630   : > { %3833 = vmatpush3.bf16.msra.mxu0 %v4015_v49 }
 0x632   : > { %2526 = vxpose.xlu1.b32.cont [4/16] (narrow) %v3789_v52, 8  ;;  %v4018_v52 = vld [vmem:[%s4873_s0 + $0x28] sm:$0xff]  }
 0x636   : > { %2527 = vxpose.xlu1.b32.cont [5/16] (narrow) %v2368_v55, 8 }
 0x63a   : > { %2528 = vxpose.xlu1.b32.cont [6/16] (narrow) %v3792_v54, 8 }
 0x63c   : > { %v2562_v6 = vpop.xlane.xlu0 %2561 }
 0x63d   : > { %v2569_v12 = vmul.f32 0.03125, %v2562_v6 }
 0x63e   : > { %2529 = vxpose.xlu1.b32.cont [7/16] (narrow) %v2378_v57, 8 }
 0x63f   : > { %v2589_v13 = vmul.f32 %v2569_v12, %v2569_v12  ;;  %v2601_v28 = vsub.f32 %v5042_v30, %v2569_v12  ;;  %v5079_v30 = vld [vmem:[%s745_s24] ss:$0 sm:$0xff] }
 0x640   : > { %v2578_v7 = vpop.xlane.xlu0 %2577 }
 0x641   : > { %v2585_v14 = vmul.f32 0.03125, %v2578_v7 }
 0x642   : > { %2530 = vxpose.xlu1.b32.cont [8/16] (narrow) %v3795_v56, 8 }
 0x643   : > { %v2593_v15 = vsub.f32 %v2585_v14, %v2589_v13 }
 0x645   : > { %v2597_v63 = vmax.f32 %v2593_v15, 0.0 }
 0x646   : > { %2531 = vxpose.xlu1.b32.cont [9/16] (narrow) %v2388_v59, 8 }
 0x647   : > { %v2605_v17 = vadd.f32 1e-12, %v2597_v63 }
 0x649   : > { %4021 = vrsqrt.f32 %v2605_v17  ;;  %v4020_v17 = vld [vmem:[%s4873_s0 + $0x38] sm:$0xff]  }
 0x64a   : > { %2532 = vxpose.xlu1.b32.cont [10/16] (narrow) %v3798_v58, 8 }
 0x64e   : > { %2533 = vxpose.xlu1.b32.cont [11/16] (narrow) %v2398_v62, 8 }
 0x652   : > { %2534 = vxpose.xlu1.b32.cont [12/16] (narrow) %v3801_v61, 8 }
 0x653   : > { %v4022_v27 = vpop.eup %4021 }
 0x654   : > { %v2613_v29 = vmul.f32 %v4022_v27, %v2601_v28 }
 0x656   : > { %2535 = vxpose.xlu1.b32.cont [13/16] (narrow) %v2408_v1, 8  ;;  %v2623_v36 = vmul.f32 %v5069_v32, %v2613_v29 }
 0x658   : > { %v5083_v39 = vadd.f32 %v5079_v30, %v2623_v36 }
 0x65a   : > { %2536 = vxpose.xlu1.b32.cont [14/16] (narrow) %v3804_v0, 8 }
 0x65e   : > { %2537 = vxpose.xlu1.b32.cont [15/16] (narrow) %v2418_v3, 8 }
 0x660   : > { %v2507_v8 = vpop.trf.xlu0 }
 0x661   : > { %v5054_v10 = vadd.f32 %v4047_v9, %v2507_v8 }
 0x662   : > { %2538 = vxpose.xlu1.b32.end [16/16] (narrow) %v3807_v2, 8 }
 0x663   : > { %2565 = vadd.xlane.f32.xlu0 %v5054_v10  ;;  %v2575_v11 = vmul.f32 %v5054_v10, %v5054_v10 }
 0x667   : > { %2581 = vadd.xlane.f32.xlu0 %v2575_v11 }
 0x67c   : > { %v2564_v60 = vpop.xlane.xlu1 %2563 }
 0x67d   : > { %v2570_v16 = vmul.f32 0.03125, %v2564_v60 }
 0x67f   : > { %v2590_v19 = vmul.f32 %v2570_v16, %v2570_v16  ;;  %v2602_v33 = vsub.f32 %v5047_v50, %v2570_v16  ;;  %v4016_v50 = vld [vmem:[%s4873_s0 + $0x18] sm:$0xff]  }
 0x680   : > { %v2580_v18 = vpop.xlane.xlu1 %2579  ;;  %3834 = vmatprep.subr.bf16.mxu0 %v4016_v50 }
 0x681   : > { %v2586_v20 = vmul.f32 0.03125, %v2580_v18  ;;  %3835 = vmatpush3.bf16.msra.mxu0 %v4016_v50  ;;  %v3420_v18 = vld [vmem:[%s748_s11] ss:$0 sm:$0xff] }
 0x682   : > { %3836 = vmatprep.subr.bf16.mxu0 %v4017_v51 }
 0x683   : > { %v2594_v21 = vsub.f32 %v2586_v20, %v2590_v19 }
 0x685   : > { %v2598_v22 = vmax.f32 %v2594_v21, 0.0  ;;  %3837 = vmatpush3.bf16.msra.mxu0 %v4017_v51 }
 0x686   : > { %3838 = vmatprep.subr.bf16.mxu0 %v4018_v52 }
 0x687   : > { %v2606_v23 = vadd.f32 1e-12, %v2598_v22 }
 0x689   : > { %4023 = vrsqrt.f32 %v2606_v23  ;;  %3839 = vmatpush3.bf16.msra.mxu0 %v4018_v52 }
 0x693   : > { %v4024_v34 = vpop.eup %4023 }
 0x694   : > { %v2614_v35 = vmul.f32 %v4024_v34, %v2602_v33 }
 0x696   : > { %v2624_v38 = vmul.f32 %v5069_v32, %v2614_v35 }
 0x698   : > { %v5086_v40 = vadd.f32 %v5079_v30, %v2624_v38 }
 0x69a   : > { %v2637_v41 = vpack.c.bf16 %v5086_v40, %v5083_v39 }
 0x69c   : > { %3824 = vmatprep.mubr.bf16.mxu1 %v2637_v41 }
 0x6a6   : > { %v2539_v42 = vpop.trf.xlu1 }
 0x6a7   : > { %v2558_v44 = vadd.f32 %v4048_v43, %v2539_v42 }
 0x6a9   : > { %2567 = vadd.xlane.f32.xlu1 %v2558_v44  ;;  %v2576_v45 = vmul.f32 %v2558_v44, %v2558_v44 }
 0x6ad   : > { %2583 = vadd.xlane.f32.xlu1 %v2576_v45 }
 0x6f0   : > { %v2566_v53 = vpop.xlane.xlu0 %2565 }
 0x6f1   : > { %v2571_v55 = vmul.f32 0.03125, %v2566_v53 }
 0x6f3   : > { %v2591_v56 = vmul.f32 %v2571_v55, %v2571_v55  ;;  %v2603_v8 = vsub.f32 %v5054_v10, %v2571_v55  ;;  %v4019_v10 = vld [vmem:[%s4873_s0 + $0x30] sm:$0xff]  }
 0x6f4   : > { %v2582_v54 = vpop.xlane.xlu0 %2581  ;;  %3840 = vmatprep.subr.bf16.mxu0 %v4019_v10 }
 0x6f5   : > { %v2587_v57 = vmul.f32 0.03125, %v2582_v54  ;;  %3841 = vmatpush3.bf16.msra.mxu0 %v4019_v10 }
 0x6f6   : > { %3842 = vmatprep.subr.bf16.mxu0 %v4020_v17 }
 0x6f7   : > { %v2595_v58 = vsub.f32 %v2587_v57, %v2591_v56 }
 0x6f9   : > { %v2599_v59 = vmax.f32 %v2595_v58, 0.0  ;;  %3843 = vmatpush3.bf16.msra.mxu0 %v4020_v17 }
 0x6fb   : > { %v2607_v0 = vadd.f32 1e-12, %v2599_v59 }
 0x6fd   : > { %4025 = vrsqrt.f32 %v2607_v0 }
 0x707   : > { %v4026_v7 = vpop.eup %4025 }
 0x708   : > { %v2615_v9 = vmul.f32 %v4026_v7, %v2603_v8 }
 0x70a   : > { %v2625_v14 = vmul.f32 %v5069_v32, %v2615_v9 }
 0x70c   : > { %v5101_v63 = vadd.f32 %v5079_v30, %v2625_v14 }
 0x736   : > { %v2568_v61 = vpop.xlane.xlu1 %2567 }
 0x737   : > { %v2572_v62 = vmul.f32 0.03125, %v2568_v61 }
 0x739   : > { %v2592_v2 = vmul.f32 %v2572_v62, %v2572_v62  ;;  %v2604_v11 = vsub.f32 %v2558_v44, %v2572_v62 }
 0x73a   : > { %v2584_v1 = vpop.xlane.xlu1 %2583 }
 0x73b   : > { %v2588_v3 = vmul.f32 0.03125, %v2584_v1 }
 0x73d   : > { %v2596_v4 = vsub.f32 %v2588_v3, %v2592_v2 }
 0x73f   : > { %v2600_v5 = vmax.f32 %v2596_v4, 0.0 }
 0x741   : > { %v2608_v6 = vadd.f32 1e-12, %v2600_v5  ;;  %v3429_v5 = vld [vmem:[%s751_s15] ss:$0 sm:$0xff] }
 0x743   : > { %4027 = vrsqrt.f32 %v2608_v6 }
 0x74d   : > { %v4028_v12 = vpop.eup %4027 }
 0x74e   : > { %v2616_v13 = vmul.f32 %v4028_v12, %v2604_v11 }
 0x750   : > { %v2626_v15 = vmul.f32 %v5069_v32, %v2616_v13 }
 0x752   : > { %v5104_v60 = vadd.f32 %v5079_v30, %v2626_v15 }
 0x754   : > { %v2638_v16 = vpack.c.bf16 %v5104_v60, %v5101_v63 }
 0x756   : > { %3825 = vmatmul.mubr.bf16.vlgmr.msra.gmra.mrb[64].mxu1 %v2638_v16 }
 0x829   : > { %v3826_v19 = vpop.f32.mrb[64].mxu1 }
 0x82a   : > { %v2753_v20 = vadd.f32 %v3826_v19, %v3420_v18  ;;  %v2744_v21 = vpop.f32.mrb[65].mxu1 }
 0x82b   : > { %v2745_v22 = vadd.f32 %v3420_v18, %v2744_v21  ;;  %v3827_v23 = vpop.f32.mrb[66].mxu1 }
 0x82c   : > { %v2765_v24 = vmul.f32 0.044715, %v2753_v20  ;;  %v2756_v25 = vadd.f32 %v3827_v23, %v3420_v18  ;;  %v2747_v26 = vpop.f32.mrb[67].mxu1  ;;  %v2761_v55 = vmul.f32 0.5, %v2753_v20 }
 0x82d   : > { %v2763_v27 = vmul.f32 0.044715, %v2745_v22  ;;  %v2748_v28 = vadd.f32 %v3420_v18, %v2747_v26  ;;  %v2759_v58 = vmul.f32 0.5, %v2745_v22 }
 0x82e   : > { %v2769_v29 = vmul.f32 %v2765_v24, %v2753_v20  ;;  %v2766_v31 = vmul.f32 0.044715, %v2756_v25  ;;  %v2762_v56 = vmul.f32 0.5, %v2756_v25 }
 0x82f   : > { %v2767_v32 = vmul.f32 %v2763_v27, %v2745_v22  ;;  %v2764_v33 = vmul.f32 0.044715, %v2748_v28  ;;  %v2760_v59 = vmul.f32 0.5, %v2748_v28 }
 0x830   : > { %v2773_v34 = vmul.f32 %v2769_v29, %v2753_v20  ;;  %v2770_v35 = vmul.f32 %v2766_v31, %v2756_v25 }
 0x831   : > { %v2771_v36 = vmul.f32 %v2767_v32, %v2745_v22  ;;  %v2768_v37 = vmul.f32 %v2764_v33, %v2748_v28 }
 0x832   : > { %v2777_v30 = vadd.f32 %v2773_v34, %v2753_v20  ;;  %v2774_v38 = vmul.f32 %v2770_v35, %v2756_v25 }
 0x833   : > { %v2772_v41 = vmul.f32 %v2768_v37, %v2748_v28  ;;  %v2775_v42 = vadd.f32 %v2771_v36, %v2745_v22 }
 0x834   : > { %v2781_v43 = vmul.f32 0.7978846, %v2777_v30  ;;  %v2778_v44 = vadd.f32 %v2774_v38, %v2756_v25 }
 0x835   : > { %v2776_v45 = vadd.f32 %v2772_v41, %v2748_v28  ;;  %v2779_v46 = vmul.f32 0.7978846, %v2775_v42 }
 0x836   : > { %4029 = vtanh.f32 %v2781_v43  ;;  %v2782_v47 = vmul.f32 0.7978846, %v2778_v44 }
 0x837   : > { %v2780_v48 = vmul.f32 0.7978846, %v2776_v45  ;;  %4031 = vtanh.f32 %v2779_v46 }
 0x838   : > { %4033 = vtanh.f32 %v2782_v47 }
 0x839   : > { %4035 = vtanh.f32 %v2780_v48 }
 0x840   : > { %v4030_v49 = vpop.eup %4029 }
 0x841   : > { %v4032_v50 = vpop.eup %4031  ;;  %v2789_v51 = vadd.f32 1.0, %v4030_v49 }
 0x842   : > { %v4034_v52 = vpop.eup %4033  ;;  %v2787_v53 = vadd.f32 1.0, %v4032_v50 }
 0x843   : > { %v4036_v54 = vpop.eup %4035  ;;  %v2790_v57 = vadd.f32 1.0, %v4034_v52  ;;  %v2793_v62 = vmul.f32 %v2789_v51, %v2761_v55 }
 0x844   : > { %v2788_v61 = vadd.f32 1.0, %v4036_v54  ;;  %v2791_v1 = vmul.f32 %v2787_v53, %v2759_v58  ;;  %v3438_v54 = vld [vmem:[%s754_s26] ss:$0 sm:$0xff]  ;;  %s5362_s26 = sld [smem:[#allocation23_spill]] }
 0x845   : > { %v2794_v0 = vmul.f32 %v2790_v57, %v2762_v56  ;;  %v3439_v58 = vld [vmem:[%s757_s9] ss:$0 sm:$0xff] }
 0x846   : > { %v2792_v2 = vmul.f32 %v2788_v61, %v2760_v59 }
 0x847   : > { %v2796_v3 = vpack.c.bf16 %v2794_v0, %v2793_v62 }
 0x848   : > { %v2795_v4 = vpack.c.bf16 %v2792_v2, %v2791_v1 }
 0x84a   : > { %3844 = vmatprep.mubr.bf16.mxu0 %v2795_v4  ;;  %p3440_p8 = scmp.ne.s32.totalorder %s5362_s26, 1 }
 0x84b   : > { %3845 = vmatmul.mubr.bf16.vlgmr.msra.gmra.mrb[64].mxu0 %v2796_v3 }
 0x91e   : > { %v3846_v6 = vpop.f32.mrb[64].mxu0 }
 0x91f   : > { %v2911_v7 = vadd.f32 %v3846_v6, %v3429_v5  ;;  %v2902_v8 = vpop.f32.mrb[65].mxu0 }
 0x920   : > { %v3847_v9 = vpop.f32.mrb[66].mxu0  ;;  %v2903_v12 = vadd.f32 %v3429_v5, %v2902_v8 }
 0x921   : > { %v5121_v11 = vadd.f32 %v2911_v7, %v5101_v63  ;;  %v2914_v13 = vadd.f32 %v3847_v9, %v3429_v5  ;;  %v2905_v14 = vpop.f32.mrb[67].mxu0 }
 0x922   : > { %v2906_v16 = vadd.f32 %v3429_v5, %v2905_v14  ;;  %v2917_v10 = vadd.f32 %v2903_v12, %v5083_v39 }
 0x923   : > { %v5124_v15 = vadd.f32 %v2914_v13, %v5104_v60  ;;  %2927 = vadd.xlane.f32.xlu0 %v5121_v11  ;;  %v2937_v19 = vmul.f32 %v5121_v11, %v5121_v11 }
 0x924   : > { %v2918_v17 = vadd.f32 %v2906_v16, %v5086_v40  ;;  %v2935_v18 = vmul.f32 %v2917_v10, %v2917_v10 }
 0x925   : > { %2929 = vadd.xlane.f32.xlu1 %v5124_v15  ;;  %v2938_v60 = vmul.f32 %v5124_v15, %v5124_v15 }
 0x926   : > { %v2936_v63 = vmul.f32 %v2918_v17, %v2918_v17 }
 0x927   : > { %2923 = vadd.xlane.f32.xlu0 %v2917_v10 }
 0x929   : > { %2925 = vadd.xlane.f32.xlu1 %v2918_v17 }
 0x92b   : > { %2939 = vadd.xlane.f32.xlu0 %v2935_v18 }
 0x92d   : > { %2941 = vadd.xlane.f32.xlu1 %v2936_v63 }
 0x92f   : > { %2943 = vadd.xlane.f32.xlu0 %v2937_v19 }
 0x931   : > { %2945 = vadd.xlane.f32.xlu1 %v2938_v60 }
 0x9b0   : > { %v2928_v20 = vpop.xlane.xlu0 %2927 }
 0x9b1   : > { %v2933_v25 = vmul.f32 0.03125, %v2928_v20 }
 0x9b2   : > { %v2930_v39 = vpop.xlane.xlu1 %2929 }
 0x9b3   : > { %v2934_v28 = vmul.f32 0.03125, %v2930_v39  ;;  %v2953_v35 = vmul.f32 %v2933_v25, %v2933_v25  ;;  %v2965_v59 = vsub.f32 %v5121_v11, %v2933_v25 }
 0x9b4   : > { %v2924_v21 = vpop.xlane.xlu0 %2923 }
 0x9b5   : > { %v2931_v22 = vmul.f32 0.03125, %v2924_v21  ;;  %v2954_v38 = vmul.f32 %v2934_v28, %v2934_v28  ;;  %v2966_v1 = vsub.f32 %v5124_v15, %v2934_v28 }
 0x9b6   : > { %v2926_v23 = vpop.xlane.xlu1 %2925 }
 0x9b7   : > { %v2932_v40 = vmul.f32 0.03125, %v2926_v23  ;;  %v2951_v26 = vmul.f32 %v2931_v22, %v2931_v22  ;;  %v2963_v52 = vsub.f32 %v2917_v10, %v2931_v22 }
 0x9b8   : > { %v2940_v24 = vpop.xlane.xlu0 %2939 }
 0x9b9   : > { %v2947_v27 = vmul.f32 0.03125, %v2940_v24  ;;  %v2952_v31 = vmul.f32 %v2932_v40, %v2932_v40  ;;  %v2964_v55 = vsub.f32 %v2918_v17, %v2932_v40 }
 0x9ba   : > { %v2942_v29 = vpop.xlane.xlu1 %2941 }
 0x9bb   : > { %v2955_v32 = vsub.f32 %v2947_v27, %v2951_v26  ;;  %v2948_v33 = vmul.f32 0.03125, %v2942_v29 }
 0x9bc   : > { %v2944_v34 = vpop.xlane.xlu0 %2943 }
 0x9bd   : > { %v2959_v36 = vmax.f32 %v2955_v32, 0.0  ;;  %v2956_v37 = vsub.f32 %v2948_v33, %v2952_v31  ;;  %v2949_v30 = vmul.f32 0.03125, %v2944_v34 }
 0x9be   : > { %v2946_v41 = vpop.xlane.xlu1 %2945 }
 0x9bf   : > { %v2967_v42 = vadd.f32 1e-12, %v2959_v36  ;;  %v2960_v43 = vmax.f32 %v2956_v37, 0.0  ;;  %v2957_v44 = vsub.f32 %v2949_v30, %v2953_v35  ;;  %v2950_v45 = vmul.f32 0.03125, %v2946_v41 }
 0x9c1   : > { %4037 = vrsqrt.f32 %v2967_v42  ;;  %v2968_v46 = vadd.f32 1e-12, %v2960_v43  ;;  %v2961_v47 = vmax.f32 %v2957_v44, 0.0  ;;  %v2958_v48 = vsub.f32 %v2950_v45, %v2954_v38 }
 0x9c3   : > { %4039 = vrsqrt.f32 %v2968_v46  ;;  %v2969_v49 = vadd.f32 1e-12, %v2961_v47  ;;  %v2962_v50 = vmax.f32 %v2958_v48, 0.0 }
 0x9c5   : > { %4041 = vrsqrt.f32 %v2969_v49  ;;  %v2970_v51 = vadd.f32 1e-12, %v2962_v50 }
 0x9c7   : > { %4043 = vrsqrt.f32 %v2970_v51 }
 0x9cb   : > { %v4038_v53 = vpop.eup %4037 }
 0x9cc   : > { %v2975_v56 = vmul.f32 %v4038_v53, %v2963_v52 }
 0x9cd   : > { %v4040_v57 = vpop.eup %4039 }
 0x9ce   : > { %v2985_v61 = vmul.f32 %v3438_v54, %v2975_v56  ;;  %v2976_v62 = vmul.f32 %v4040_v57, %v2964_v55 }
 0x9cf   : > { %v4042_v0 = vpop.eup %4041 }
 0x9d0   : > { %v2995_v2 = vadd.f32 %v3439_v58, %v2985_v61  ;;  %v2986_v3 = vmul.f32 %v3438_v54, %v2976_v62  ;;  %v2977_v4 = vmul.f32 %v4042_v0, %v2965_v59 }
 0x9d1   : > { %v4044_v5 = vpop.eup %4043 }
 0x9d2   : > { %2999 = vst [vmem:[#allocation2] sm:$0xff] %v2995_v2  ;;  %v2996_v6 = vadd.f32 %v3439_v58, %v2986_v3  ;;  %v2987_v7 = vmul.f32 %v3438_v54, %v2977_v4  ;;  %v2978_v8 = vmul.f32 %v4044_v5, %v2966_v1  ;;  %3006 = sbr.rel (%p3440_p8) target bundleno = 2521 (0x9d9), region = 112  ;;  %3007 = vst [vmem:[%s4875_s27] sm:$0xff] (!%p3440_p8), %v2995_v2 }
 0x9d4   : > { %3000 = vst [vmem:[#allocation2 + $0x8] sm:$0xff] %v2996_v6  ;;  %v2997_v9 = vadd.f32 %v3439_v58, %v2987_v7  ;;  %v2988_v12 = vmul.f32 %v3438_v54, %v2978_v8  ;;  %3008 = vst [vmem:[%s4875_s27 + $0x8] sm:$0xff] (!%p3440_p8), %v2996_v6 }
 0x9d6   : > { %3001 = vst [vmem:[#allocation2 + $0x10] sm:$0xff] %v2997_v9  ;;  %v2998_v13 = vadd.f32 %v3439_v58, %v2988_v12  ;;  %3009 = vst [vmem:[%s4875_s27 + $0x10] sm:$0xff] (!%p3440_p8), %v2997_v9 }
 0x9d8   : > { %3002 = vst [vmem:[#allocation2 + $0x18] sm:$0xff] %v2998_v13  ;;  %3010 = vst [vmem:[%s4875_s27 + $0x18] sm:$0xff] (!%p3440_p8), %v2998_v13 }
 0x9d9 PF: > { %s5363_s6 = sld [smem:[#allocation24_spill]]  ;;  %s5364_s9 = sld [smem:[#allocation28_spill]] }
 0x9da   : > { %s5365_s23 = sld [smem:[#allocation49_spill]]  ;;  %s3025_s14 = sshll.u32 %s4875_s27, 4  ;;  %s5158_s14 = int_to_ptr.vmem [resolvable:$true] %s3025_s14 }
 0x9db   : > { %s5367_s8 = sand.u32 1, %s4333_s22   ;;  %s4223_s17 = scalar_lea.vmem %s5158_s14, 512 }
 0x9dc   : > { %s5162_s19 = scalar_lea.sflag [#allocation5], %s5367_s8  ;;  %p4224_p4 = scmp.ne.s32.totalorder %s5158_s14, %s4223_s17 }
 0x9dd   : > { %s4369_s29 = smov [#allocation13]  }
 0x9de   : > { %s4227_s7 = sshll.u32 %s4369_s29, 4  ;;  %s4228_s7 = int_to_ptr.vmem [resolvable:$false] %s4227_s7 }
 0x9df   : > { %s3449_s2 = sshll.u32 %s5363_s6, 9  ;;  %p5368_p5 = scmp.ne.s32.totalorder %s5364_s9, 0 }
 0x9e0   : > { %s5366_s10 = smov %s5365_s23  ;;  %s5155_s18 = scalar_lea.hbm %s5365_s23, %s3449_s2 }
 0x9e1   : > { %p4225_p1 = pnand %p4224_p4, %p5368_p5  ;;  %s4229_s1 = scalar_lea.vmem %s4228_s7, 1024 }
 0x9e2   : > { %p4230_p10 = scmp.lt.s32.totalorder %s5158_s14, %s4228_s7  ;;  %p4231_p2 = scmp.lt.s32.totalorder %s4229_s1, %s4223_s17 }
 0x9e3   : > { %p4226_p6 = pneg %p4225_p1 }
 0x9e4   : > { %p4232_p9 = por %p4231_p2, %p4230_p10 }
 0x9e6   : > { %p4233_p7 = pnand %p4232_p9, %p4226_p6 }
 0x9e8   : > { %4236 = shalt.err (!%p4233_p7)
}
 0x9e9   : > { %s4237_s27 = scalar_lea.hbm %s5155_s18, 512  ;;  %s4241_s11 = scalar_lea.hbm %s5366_s10, 1024 }
 0x9ea   : > { %p4238_p11 = scmp.ne.s32.totalorder %s5155_s18, %s4237_s27  ;;  %p4242_p3 = scmp.lt.u32.totalorder %s5155_s18, %s5366_s10 }
 0x9eb   : > { %p4243_p0 = scmp.lt.u32.totalorder %s4241_s11, %s4237_s27  ;;  %p4245_p4 = scmp.lt.u32.totalorder %s4237_s27, %s5155_s18 }
 0x9ec   : > { %p4239_p12 = pnand %p4238_p11, %p5368_p5 }
 0x9ed   : > { %p4244_p8 = por %p4243_p0, %p4242_p3 }
 0x9ee   : > { %p4240_p13 = pneg %p4239_p12 }
 0x9ef   : > { %p4246_p1 = por %p4245_p4, %p4244_p8 }
 0x9f1   : > { %p4247_p6 = pnand %p4246_p1, %p4240_p13 }
 0x9f3   : > { %4250 = shalt.err (!%p4247_p6)
}
 0x9f4   : > { %s4370_s15 = smov 128   ;;  %s4371_s25 = smov 8  }
 0x9f5   : > { %3872 = dma.vmem_to_hbm [thread:$0]  (%p5368_p5), %s5158_s14, 512, %s5155_s18, %s5162_s19, %s4370_s15, %s4370_s15, %s4371_s25  }
 0x9f6 PF: > { %s5369_s5 = sld [smem:[#allocation21_spill]]  ;;  %s5370_s12 = sld [smem:[#allocation29_spill]] }
 0x9f7   : > { %p3905_p10 = scmp.ge.s32.totalorder %s4357_s28, 2 }
 0x9fc   : > { %s3040_s30 = sand.u32 1, %s5369_s5   ;;  %p5371_p2 = scmp.ne.s32.totalorder %s5370_s12, 0 }
 0x9fd   : > { %s3041_s0 = scalar_lea.sflag [#allocation5], %s3040_s30 }
 0x9fe   : > { %p3895_p9 = pnand %p3905_p10, %p5371_p2 }
 0xa00   : > { %4312 = dma.done.wait (!%p3895_p9), %s3041_s0, 512  }
 0xa01   : > { %4314 = vsyncadd (!%p3895_p9), %s3041_s0, 4294966784  ;;  %s33_s28 = sadd.s32 1, %s4357_s28   ;;  %s5372_s18 = sld [smem:[#allocation19_spill]] }
 0xa02   : > { %p30_p7 = scmp.ge.s32.totalorder %s33_s28, 6   ;;  %s5373_s19 = sld [smem:[#allocation20_spill]] }
 0xa03   : > { %s5374_s20 = sld [smem:[#allocation32_spill]]  ;;  %s5375_s26 = sld [smem:[#allocation22_spill]] }
 0xa04   : > { %s5376_s23 = sld [smem:[#allocation33_spill]]  ;;  %s5377_s24 = sld [smem:[#allocation25_spill]] }
 0xa05   : > { %s5378_s25 = sld [smem:[#allocation26_spill]]  ;;  %s5379_s6 = sld [smem:[#allocation30_spill]] }
 0xa06   : > { %s5380_s27 = sld [smem:[#allocation31_spill]]  ;;  %s5381_s21 = smov %s4333_s22 }
 0xa07   :  { %32 = sbr.rel (!%p30_p7) target bundleno = 28 (0x1c), region = 191 }
 0xa09   : > { %s5382_s22 = smov %s5375_s26 }
 0xa0b   : > { %s5383_s26 = smov %s5379_s6 }
 0xa0e   :  { %3046 = vsyncpa [#allocation4], 1 }
 0xa0f   :  { %3048 = vsyncpa [#allocation4 + $0x1], 1 }
 0xa10   :  { %3049 = vsyncpa [#allocation7], 1 }
 0xa11   :  { %3050 = vsyncpa [#allocation10], 1 }
 0xa12   :  { %3051 = vsyncpa [#allocation5], 1 }
 0xa13   :  { %3053 = vsyncpa [#allocation5 + $0x1], 1 }

</bundles_post_ra>
